<compile_context>
chip_gen: v7x
topology: tpu7x:2x2x1
jax: 0.10.0
libtpu: 0.0.40
codegen_flags: <defaults>
</compile_context>

<pallas_src>
import functools

import jax
import jax.numpy as jnp
import numpy as np
from jax import lax
from jax.experimental import pallas as pl
from jax.experimental.pallas import tpu as pltpu  # noqa: F401  (TPU backend)


# ---------------------------------------------------------------------------
# Kernel
# ---------------------------------------------------------------------------
def _lstm_kernel(x_ref, wp_ref, bp_ref, out_ref, *, B, S, I, H):
    """x_ref: (B,S,I) f32; wp_ref: (I+4H, 128) bf16; bp_ref: (3, 128) f32;
    out_ref: (B, 128) f32 (fc output lane-padded)."""
    f32 = jnp.float32
    bf16 = jnp.bfloat16
    G = 4 * H  # == 128 lanes for H=32

    # Static slices into the packed weight array (all offsets are multiples of
    # the bf16 sublane tile, 16): wih0 | whh0 | wih1 | whh1 | wfc.
    wih0 = wp_ref[0:I, :]                    # (I, 4H)  bf16
    whh0 = wp_ref[I:I + H, :]                # (H, 4H)
    wih1 = wp_ref[I + H:I + 2 * H, :]        # (H, 4H)
    whh1 = wp_ref[I + 2 * H:I + 3 * H, :]    # (H, 4H)
    wfc = wp_ref[I + 3 * H:I + 4 * H, :]     # (H, 128)

    bp = bp_ref[...]                         # (3, 128) f32
    b0 = bp[0:1, :]                          # (1, 4H)
    b1 = jnp.broadcast_to(bp[1:2, :], (B, G))  # hoisted broadcast (no CSE in loop)
    bfc = bp[2:3, :]                         # (1, 128)

    # --- Hoisted, time-invariant layer-0 input projection (one MXU op) ------
    x = x_ref[...]                                        # (B, S, I) f32
    x2 = x.reshape(B * S, I).astype(bf16)                 # leading-dim merge
    xproj = jnp.dot(x2, wih0, preferred_element_type=f32) + b0   # (B*S, 4H)
    xproj = xproj.reshape(B, S, G)                        # leading-dim split

    def activate(gates, c):
        # Gate lane order (host-side reorder): i, f, o, g -> one sigmoid pass
        # over the first 3H lanes, one tanh pass over the last H lanes.
        # (Mid-vreg lane extracts left to Mosaic / XLU; marginal per review.)
        sig = jax.nn.sigmoid(gates[:, :3 * H])
        g = jnp.tanh(gates[:, 3 * H:])
        i, f, o = sig[:, :H], sig[:, H:2 * H], sig[:, 2 * H:]
        c_new = f * c + i * g
        return o * jnp.tanh(c_new), c_new

    zeros = jnp.zeros((B, H), f32)
    h0 = c0 = h1 = c1 = zeros

    # S is small and static -> fully unrolled; LSTM state stays in vregs.
    for t in range(S):
        # Layer 0: x-projection already hoisted; only the recurrent (B,H)@(H,4H).
        gates0 = xproj[:, t, :] + jnp.dot(h0.astype(bf16), whh0,
                                          preferred_element_type=f32)
        h0, c0 = activate(gates0, c0)
        # Layer 1: split dots; the h1 dot is independent of the fresh h0.
        gates1 = (jnp.dot(h1.astype(bf16), whh1, preferred_element_type=f32)
                  + jnp.dot(h0.astype(bf16), wih1, preferred_element_type=f32)
                  + b1)
        h1, c1 = activate(gates1, c1)

    # fc head on the final top-layer hidden state (lane-padded, unmasked store).
    out_ref[...] = (jnp.dot(h1.astype(bf16), wfc, preferred_element_type=f32)
                    + bfc)


# ---------------------------------------------------------------------------
# Host-side parameter prep (PyTorch layout -> kernel layout)
# ---------------------------------------------------------------------------
def _reorder_ifgo_to_ifog(m):
    """Reorder last-axis gate blocks from PyTorch (i,f,g,o) to (i,f,o,g)."""
    H = m.shape[-1] // 4
    return jnp.concatenate([m[..., :2 * H], m[..., 3 * H:4 * H],
                            m[..., 2 * H:3 * H]], axis=-1)


def prepare_kernel_params(params, lane_pad=128):
    """Pack all weights into one bf16 array and all biases into one f32 array."""
    H = params["w_hh_l0"].shape[1]
    I = params["w_ih_l0"].shape[1]
    O = params["fc_b"].shape[0]
    assert 4 * H == lane_pad, "kernel assumes gate width 4H == 128 lanes"

    def layer(w_ih, w_hh, b_ih, b_hh):
        wih = _reorder_ifgo_to_ifog(w_ih.T)               # (in, 4H)
        whh = _reorder_ifgo_to_ifog(w_hh.T)               # (H, 4H)
        b = _reorder_ifgo_to_ifog((b_ih + b_hh)[None, :])  # (1, 4H) combined bias
        return wih, whh, b

    wih0, whh0, b0 = layer(params["w_ih_l0"], params["w_hh_l0"],
                           params["b_ih_l0"], params["b_hh_l0"])
    wih1, whh1, b1 = layer(params["w_ih_l1"], params["w_hh_l1"],
                           params["b_ih_l1"], params["b_hh_l1"])

    wfc = jnp.zeros((H, lane_pad), jnp.float32).at[:, :O].set(params["fc_w"].T)
    bfc = jnp.zeros((1, lane_pad), jnp.float32).at[:, :O].set(
        params["fc_b"][None, :])

    # Packed weights (bf16 MXU operands): rows [wih0 | whh0 | wih1 | whh1 | wfc].
    wpack = jnp.concatenate([wih0, whh0, wih1, whh1, wfc],
                            axis=0).astype(jnp.bfloat16)          # (I+4H, 128)
    # Packed biases stay f32 (elementwise math is f32 on all generations).
    bpack = jnp.concatenate([b0, b1, bfc], axis=0).astype(jnp.float32)  # (3, 128)

    return {"wpack": wpack, "bpack": bpack,
            "dims": {"I": I, "H": H, "O": O, "lanes": lane_pad}}


def lstm_model_forward(x, kparams, output_size):
    """x: (batch, seq, input_size) f32  ->  (batch, output_size) f32."""
    B, S, I = x.shape
    H = kparams["dims"]["H"]
    lanes = kparams["dims"]["lanes"]
    kernel = functools.partial(_lstm_kernel, B=B, S=S, I=I, H=H)

    # No grid / BlockSpecs: the whole problem (~60 KB) is a single resident
    # VMEM block; the recurrence runs entirely inside the kernel.
    # TODO(synk): if batch/hidden grow, add a leading batch-tile grid axis with
    # dimension_semantics=("parallel",...) so v7x's second TensorCore is used.
    out = pl.pallas_call(
        kernel,
        out_shape=jax.ShapeDtypeStruct((B, lanes), jnp.float32),
    )(x, kparams["wpack"], kparams["bpack"])
    return out[:, :output_size]


# ---------------------------------------------------------------------------
# PyTorch-style init + pure-JAX f32 reference
# ---------------------------------------------------------------------------
def init_params(key, input_size, hidden_size, output_size):
    """PyTorch nn.LSTM layout, U(-1/sqrt(H), 1/sqrt(H)), gate order (i,f,g,o)."""
    H = hidden_size
    bound = 1.0 / np.sqrt(H)
    ks = jax.random.split(key, 10)
    u = lambda k, shape: jax.random.uniform(
        k, shape, jnp.float32, minval=-bound, maxval=bound)
    return {
        "w_ih_l0": u(ks[0], (4 * H, input_size)),
        "w_hh_l0": u(ks[1], (4 * H, H)),
        "b_ih_l0": u(ks[2], (4 * H,)),
        "b_hh_l0": u(ks[3], (4 * H,)),
        "w_ih_l1": u(ks[4], (4 * H, H)),
        "w_hh_l1": u(ks[5], (4 * H, H)),
        "b_ih_l1": u(ks[6], (4 * H,)),
        "b_hh_l1": u(ks[7], (4 * H,)),
        "fc_w":    u(ks[8], (output_size, H)),
        "fc_b":    u(ks[9], (output_size,)),
    }


def lstm_model_ref(x, params):
    """Pure-JAX reference with PyTorch nn.LSTM semantics (gate order i,f,g,o)."""
    H = params["w_hh_l0"].shape[1]
    B = x.shape[0]

    def cell(x_t, h, c, w_ih, w_hh, b_ih, b_hh):
        g = x_t @ w_ih.T + h @ w_hh.T + b_ih + b_hh
        i = jax.nn.sigmoid(g[:, 0 * H:1 * H])
        f = jax.nn.sigmoid(g[:, 1 * H:2 * H])
        gg = jnp.tanh(g[:, 2 * H:3 * H])
        o = jax.nn.sigmoid(g[:, 3 * H:4 * H])
        c_new = f * c + i * gg
        return o * jnp.tanh(c_new), c_new

    def step(carry, x_t):
        h0, c0, h1, c1 = carry
        h0, c0 = cell(x_t, h0, c0, params["w_ih_l0"], params["w_hh_l0"],
                      params["b_ih_l0"], params["b_hh_l0"])
        h1, c1 = cell(h0, h1, c1, params["w_ih_l1"], params["w_hh_l1"],
                      params["b_ih_l1"], params["b_hh_l1"])
        return (h0, c0, h1, c1), None

    z = jnp.zeros((B, H), jnp.float32)
    (_, _, h1, _), _ = lax.scan(step, (z, z, z, z), jnp.swapaxes(x, 0, 1))
    return h1 @ params["fc_w"].T + params["fc_b"]


# ---------------------------------------------------------------------------
if __name__ == "__main__":
    # Small shapes consistent with the module's forward (the real module uses
    # input_size=224*224*3, hidden=256 -- scaled down for the test):
    #   x: (batch, seq, input_size) -> out: (batch, 11)
    batch, seq = 2, 8
    input_size, hidden_size, output_size = 64, 32, 11

    key = jax.random.PRNGKey(0)
    k_x, k_p = jax.random.split(key)
    x = jax.random.normal(k_x, (batch, seq, input_size), jnp.float32)
    params = init_params(k_p, input_size, hidden_size, output_size)
    kparams = prepare_kernel_params(params)

    out = jax.block_until_ready(lstm_model_forward(x, kparams, output_size))
    ref = jax.block_until_ready(lstm_model_ref(x, params))

    assert out.shape == (batch, output_size)
    # Tolerance loosened for bf16 MXU operands (f32 accumulation / gate math).
    np.testing.assert_allclose(np.asarray(out), np.asarray(ref),
                               rtol=2e-2, atol=2e-2)
    print("KERNEL_OK")
</pallas_src>

<mosaic_0001>
module attributes {stable_mosaic.version = 11 : i64} {
  func.func @_lstm_kernel(%arg0: memref<2x8x64xf32, #tpu.memory_space<vmem>>, %arg1: memref<192x128xbf16, #tpu.memory_space<vmem>>, %arg2: memref<3x128xf32, #tpu.memory_space<vmem>>, %arg3: memref<2x128xf32, #tpu.memory_space<vmem>>) attributes {dimension_semantics = [], scalar_prefetch = 0 : i64, scratch_operands = 0 : i64, tpu.core_type = #tpu.core_type<tc>} {
    %c0 = arith.constant 0 : index
    %c0_0 = arith.constant 0 : index
    %0 = vector.load %arg1[%c0, %c0_0] : memref<192x128xbf16, #tpu.memory_space<vmem>>, vector<64x128xbf16>
    %c64 = arith.constant 64 : index
    %c0_1 = arith.constant 0 : index
    %1 = vector.load %arg1[%c64, %c0_1] : memref<192x128xbf16, #tpu.memory_space<vmem>>, vector<32x128xbf16>
    %c96 = arith.constant 96 : index
    %c0_2 = arith.constant 0 : index
    %2 = vector.load %arg1[%c96, %c0_2] : memref<192x128xbf16, #tpu.memory_space<vmem>>, vector<32x128xbf16>
    %c128 = arith.constant 128 : index
    %c0_3 = arith.constant 0 : index
    %3 = vector.load %arg1[%c128, %c0_3] : memref<192x128xbf16, #tpu.memory_space<vmem>>, vector<32x128xbf16>
    %c160 = arith.constant 160 : index
    %c0_4 = arith.constant 0 : index
    %4 = vector.load %arg1[%c160, %c0_4] : memref<192x128xbf16, #tpu.memory_space<vmem>>, vector<32x128xbf16>
    %c0_5 = arith.constant 0 : index
    %c0_6 = arith.constant 0 : index
    %5 = vector.load %arg2[%c0_5, %c0_6] : memref<3x128xf32, #tpu.memory_space<vmem>>, vector<3x128xf32>
    %6 = vector.extract_strided_slice %5 {offsets = [0, 0], sizes = [1, 128], strides = [1, 1]} : vector<3x128xf32> to vector<1x128xf32>
    %7 = vector.extract_strided_slice %5 {offsets = [1, 0], sizes = [1, 128], strides = [1, 1]} : vector<3x128xf32> to vector<1x128xf32>
    %8 = vector.shape_cast %7 : vector<1x128xf32> to vector<1x128xf32>
    %9 = vector.broadcast %8 : vector<1x128xf32> to vector<2x128xf32>
    %10 = vector.extract_strided_slice %5 {offsets = [2, 0], sizes = [1, 128], strides = [1, 1]} : vector<3x128xf32> to vector<1x128xf32>
    %c0_7 = arith.constant 0 : index
    %c0_8 = arith.constant 0 : index
    %c0_9 = arith.constant 0 : index
    %11 = vector.load %arg0[%c0_7, %c0_8, %c0_9] : memref<2x8x64xf32, #tpu.memory_space<vmem>>, vector<2x8x64xf32>
    %12 = vector.shape_cast %11 : vector<2x8x64xf32> to vector<16x64xf32>
    %13 = arith.truncf %12 : vector<16x64xf32> to vector<16x64xbf16>
    %cst = arith.constant dense<0.000000e+00> : vector<16x128xf32>
    %14 = tpu.matmul %13, %0, %cst {dimension_numbers = #tpu.dot_dimension_numbers<[1], [0], [0], [1], [0, 0, 1, 1], [], []>} : vector<16x64xbf16>, vector<64x128xbf16>, vector<16x128xf32> -> vector<16x128xf32>
    %15 = vector.broadcast %6 : vector<1x128xf32> to vector<16x128xf32>
    %16 = arith.addf %14, %15 : vector<16x128xf32>
    %17 = vector.shape_cast %16 : vector<16x128xf32> to vector<2x8x128xf32>
    %cst_10 = arith.constant 0.000000e+00 : f32
    %18 = vector.broadcast %cst_10 : f32 to vector<2x32xf32>
    %19 = vector.extract_strided_slice %17 {offsets = [0, 0, 0], sizes = [2, 1, 128], strides = [1, 1, 1]} : vector<2x8x128xf32> to vector<2x1x128xf32>
    %20 = vector.shape_cast %19 : vector<2x1x128xf32> to vector<2x128xf32>
    %21 = arith.truncf %18 : vector<2x32xf32> to vector<2x32xbf16>
    %cst_11 = arith.constant dense<0.000000e+00> : vector<2x128xf32>
    %22 = tpu.matmul %21, %1, %cst_11 {dimension_numbers = #tpu.dot_dimension_numbers<[1], [0], [0], [1], [0, 0, 1, 1], [], []>} : vector<2x32xbf16>, vector<32x128xbf16>, vector<2x128xf32> -> vector<2x128xf32>
    %23 = arith.addf %20, %22 : vector<2x128xf32>
    %24 = vector.extract_strided_slice %23 {offsets = [0, 0], sizes = [2, 96], strides = [1, 1]} : vector<2x128xf32> to vector<2x96xf32>
    %25 = arith.negf %24 : vector<2x96xf32>
    %26 = math.exp %25 : vector<2x96xf32>
    %cst_12 = arith.constant 1.000000e+00 : f32
    %27 = vector.broadcast %cst_12 : f32 to vector<2x96xf32>
    %28 = arith.addf %27, %26 : vector<2x96xf32>
    %29 = arith.divf %27, %28 : vector<2x96xf32>
    %30 = vector.extract_strided_slice %23 {offsets = [0, 96], sizes = [2, 32], strides = [1, 1]} : vector<2x128xf32> to vector<2x32xf32>
    %31 = math.tanh %30 : vector<2x32xf32>
    %32 = vector.extract_strided_slice %29 {offsets = [0, 0], sizes = [2, 32], strides = [1, 1]} : vector<2x96xf32> to vector<2x32xf32>
    %33 = vector.extract_strided_slice %29 {offsets = [0, 32], sizes = [2, 32], strides = [1, 1]} : vector<2x96xf32> to vector<2x32xf32>
    %34 = vector.extract_strided_slice %29 {offsets = [0, 64], sizes = [2, 32], strides = [1, 1]} : vector<2x96xf32> to vector<2x32xf32>
    %35 = arith.mulf %33, %18 : vector<2x32xf32>
    %36 = arith.mulf %32, %31 : vector<2x32xf32>
    %37 = arith.addf %35, %36 : vector<2x32xf32>
    %38 = math.tanh %37 : vector<2x32xf32>
    %39 = arith.mulf %34, %38 : vector<2x32xf32>
    %40 = arith.truncf %18 : vector<2x32xf32> to vector<2x32xbf16>
    %cst_13 = arith.constant dense<0.000000e+00> : vector<2x128xf32>
    %41 = tpu.matmul %40, %3, %cst_13 {dimension_numbers = #tpu.dot_dimension_numbers<[1], [0], [0], [1], [0, 0, 1, 1], [], []>} : vector<2x32xbf16>, vector<32x128xbf16>, vector<2x128xf32> -> vector<2x128xf32>
    %42 = arith.truncf %39 : vector<2x32xf32> to vector<2x32xbf16>
    %cst_14 = arith.constant dense<0.000000e+00> : vector<2x128xf32>
    %43 = tpu.matmul %42, %2, %cst_14 {dimension_numbers = #tpu.dot_dimension_numbers<[1], [0], [0], [1], [0, 0, 1, 1], [], []>} : vector<2x32xbf16>, vector<32x128xbf16>, vector<2x128xf32> -> vector<2x128xf32>
    %44 = arith.addf %41, %43 : vector<2x128xf32>
    %45 = arith.addf %44, %9 : vector<2x128xf32>
    %46 = vector.extract_strided_slice %45 {offsets = [0, 0], sizes = [2, 96], strides = [1, 1]} : vector<2x128xf32> to vector<2x96xf32>
    %47 = arith.negf %46 : vector<2x96xf32>
    %48 = math.exp %47 : vector<2x96xf32>
    %cst_15 = arith.constant 1.000000e+00 : f32
    %49 = vector.broadcast %cst_15 : f32 to vector<2x96xf32>
    %50 = arith.addf %49, %48 : vector<2x96xf32>
    %51 = arith.divf %49, %50 : vector<2x96xf32>
    %52 = vector.extract_strided_slice %45 {offsets = [0, 96], sizes = [2, 32], strides = [1, 1]} : vector<2x128xf32> to vector<2x32xf32>
    %53 = math.tanh %52 : vector<2x32xf32>
    %54 = vector.extract_strided_slice %51 {offsets = [0, 0], sizes = [2, 32], strides = [1, 1]} : vector<2x96xf32> to vector<2x32xf32>
    %55 = vector.extract_strided_slice %51 {offsets = [0, 32], sizes = [2, 32], strides = [1, 1]} : vector<2x96xf32> to vector<2x32xf32>
    %56 = vector.extract_strided_slice %51 {offsets = [0, 64], sizes = [2, 32], strides = [1, 1]} : vector<2x96xf32> to vector<2x32xf32>
    %57 = arith.mulf %55, %18 : vector<2x32xf32>
    %58 = arith.mulf %54, %53 : vector<2x32xf32>
    %59 = arith.addf %57, %58 : vector<2x32xf32>
    %60 = math.tanh %59 : vector<2x32xf32>
    %61 = arith.mulf %56, %60 : vector<2x32xf32>
    %62 = vector.extract_strided_slice %17 {offsets = [0, 1, 0], sizes = [2, 1, 128], strides = [1, 1, 1]} : vector<2x8x128xf32> to vector<2x1x128xf32>
    %63 = vector.shape_cast %62 : vector<2x1x128xf32> to vector<2x128xf32>
    %64 = arith.truncf %39 : vector<2x32xf32> to vector<2x32xbf16>
    %cst_16 = arith.constant dense<0.000000e+00> : vector<2x128xf32>
    %65 = tpu.matmul %64, %1, %cst_16 {dimension_numbers = #tpu.dot_dimension_numbers<[1], [0], [0], [1], [0, 0, 1, 1], [], []>} : vector<2x32xbf16>, vector<32x128xbf16>, vector<2x128xf32> -> vector<2x128xf32>
    %66 = arith.addf %63, %65 : vector<2x128xf32>
    %67 = vector.extract_strided_slice %66 {offsets = [0, 0], sizes = [2, 96], strides = [1, 1]} : vector<2x128xf32> to vector<2x96xf32>
    %68 = arith.negf %67 : vector<2x96xf32>
    %69 = math.exp %68 : vector<2x96xf32>
    %cst_17 = arith.constant 1.000000e+00 : f32
    %70 = vector.broadcast %cst_17 : f32 to vector<2x96xf32>
    %71 = arith.addf %70, %69 : vector<2x96xf32>
    %72 = arith.divf %70, %71 : vector<2x96xf32>
    %73 = vector.extract_strided_slice %66 {offsets = [0, 96], sizes = [2, 32], strides = [1, 1]} : vector<2x128xf32> to vector<2x32xf32>
    %74 = math.tanh %73 : vector<2x32xf32>
    %75 = vector.extract_strided_slice %72 {offsets = [0, 0], sizes = [2, 32], strides = [1, 1]} : vector<2x96xf32> to vector<2x32xf32>
    %76 = vector.extract_strided_slice %72 {offsets = [0, 32], sizes = [2, 32], strides = [1, 1]} : vector<2x96xf32> to vector<2x32xf32>
    %77 = vector.extract_strided_slice %72 {offsets = [0, 64], sizes = [2, 32], strides = [1, 1]} : vector<2x96xf32> to vector<2x32xf32>
    %78 = arith.mulf %76, %37 : vector<2x32xf32>
    %79 = arith.mulf %75, %74 : vector<2x32xf32>
    %80 = arith.addf %78, %79 : vector<2x32xf32>
    %81 = math.tanh %80 : vector<2x32xf32>
    %82 = arith.mulf %77, %81 : vector<2x32xf32>
    %83 = arith.truncf %61 : vector<2x32xf32> to vector<2x32xbf16>
    %cst_18 = arith.constant dense<0.000000e+00> : vector<2x128xf32>
    %84 = tpu.matmul %83, %3, %cst_18 {dimension_numbers = #tpu.dot_dimension_numbers<[1], [0], [0], [1], [0, 0, 1, 1], [], []>} : vector<2x32xbf16>, vector<32x128xbf16>, vector<2x128xf32> -> vector<2x128xf32>
    %85 = arith.truncf %82 : vector<2x32xf32> to vector<2x32xbf16>
    %cst_19 = arith.constant dense<0.000000e+00> : vector<2x128xf32>
    %86 = tpu.matmul %85, %2, %cst_19 {dimension_numbers = #tpu.dot_dimension_numbers<[1], [0], [0], [1], [0, 0, 1, 1], [], []>} : vector<2x32xbf16>, vector<32x128xbf16>, vector<2x128xf32> -> vector<2x128xf32>
    %87 = arith.addf %84, %86 : vector<2x128xf32>
    %88 = arith.addf %87, %9 : vector<2x128xf32>
    %89 = vector.extract_strided_slice %88 {offsets = [0, 0], sizes = [2, 96], strides = [1, 1]} : vector<2x128xf32> to vector<2x96xf32>
    %90 = arith.negf %89 : vector<2x96xf32>
    %91 = math.exp %90 : vector<2x96xf32>
    %cst_20 = arith.constant 1.000000e+00 : f32
    %92 = vector.broadcast %cst_20 : f32 to vector<2x96xf32>
    %93 = arith.addf %92, %91 : vector<2x96xf32>
    %94 = arith.divf %92, %93 : vector<2x96xf32>
    %95 = vector.extract_strided_slice %88 {offsets = [0, 96], sizes = [2, 32], strides = [1, 1]} : vector<2x128xf32> to vector<2x32xf32>
    %96 = math.tanh %95 : vector<2x32xf32>
    %97 = vector.extract_strided_slice %94 {offsets = [0, 0], sizes = [2, 32], strides = [1, 1]} : vector<2x96xf32> to vector<2x32xf32>
    %98 = vector.extract_strided_slice %94 {offsets = [0, 32], sizes = [2, 32], strides = [1, 1]} : vector<2x96xf32> to vector<2x32xf32>
    %99 = vector.extract_strided_slice %94 {offsets = [0, 64], sizes = [2, 32], strides = [1, 1]} : vector<2x96xf32> to vector<2x32xf32>
    %100 = arith.mulf %98, %59 : vector<2x32xf32>
    %101 = arith.mulf %97, %96 : vector<2x32xf32>
    %102 = arith.addf %100, %101 : vector<2x32xf32>
    %103 = math.tanh %102 : vector<2x32xf32>
    %104 = arith.mulf %99, %103 : vector<2x32xf32>
    %105 = vector.extract_strided_slice %17 {offsets = [0, 2, 0], sizes = [2, 1, 128], strides = [1, 1, 1]} : vector<2x8x128xf32> to vector<2x1x128xf32>
    %106 = vector.shape_cast %105 : vector<2x1x128xf32> to vector<2x128xf32>
    %107 = arith.truncf %82 : vector<2x32xf32> to vector<2x32xbf16>
    %cst_21 = arith.constant dense<0.000000e+00> : vector<2x128xf32>
    %108 = tpu.matmul %107, %1, %cst_21 {dimension_numbers = #tpu.dot_dimension_numbers<[1], [0], [0], [1], [0, 0, 1, 1], [], []>} : vector<2x32xbf16>, vector<32x128xbf16>, vector<2x128xf32> -> vector<2x128xf32>
    %109 = arith.addf %106, %108 : vector<2x128xf32>
    %110 = vector.extract_strided_slice %109 {offsets = [0, 0], sizes = [2, 96], strides = [1, 1]} : vector<2x128xf32> to vector<2x96xf32>
    %111 = arith.negf %110 : vector<2x96xf32>
    %112 = math.exp %111 : vector<2x96xf32>
    %cst_22 = arith.constant 1.000000e+00 : f32
    %113 = vector.broadcast %cst_22 : f32 to vector<2x96xf32>
    %114 = arith.addf %113, %112 : vector<2x96xf32>
    %115 = arith.divf %113, %114 : vector<2x96xf32>
    %116 = vector.extract_strided_slice %109 {offsets = [0, 96], sizes = [2, 32], strides = [1, 1]} : vector<2x128xf32> to vector<2x32xf32>
    %117 = math.tanh %116 : vector<2x32xf32>
    %118 = vector.extract_strided_slice %115 {offsets = [0, 0], sizes = [2, 32], strides = [1, 1]} : vector<2x96xf32> to vector<2x32xf32>
    %119 = vector.extract_strided_slice %115 {offsets = [0, 32], sizes = [2, 32], strides = [1, 1]} : vector<2x96xf32> to vector<2x32xf32>
    %120 = vector.extract_strided_slice %115 {offsets = [0, 64], sizes = [2, 32], strides = [1, 1]} : vector<2x96xf32> to vector<2x32xf32>
    %121 = arith.mulf %119, %80 : vector<2x32xf32>
    %122 = arith.mulf %118, %117 : vector<2x32xf32>
    %123 = arith.addf %121, %122 : vector<2x32xf32>
    %124 = math.tanh %123 : vector<2x32xf32>
    %125 = arith.mulf %120, %124 : vector<2x32xf32>
    %126 = arith.truncf %104 : vector<2x32xf32> to vector<2x32xbf16>
    %cst_23 = arith.constant dense<0.000000e+00> : vector<2x128xf32>
    %127 = tpu.matmul %126, %3, %cst_23 {dimension_numbers = #tpu.dot_dimension_numbers<[1], [0], [0], [1], [0, 0, 1, 1], [], []>} : vector<2x32xbf16>, vector<32x128xbf16>, vector<2x128xf32> -> vector<2x128xf32>
    %128 = arith.truncf %125 : vector<2x32xf32> to vector<2x32xbf16>
    %cst_24 = arith.constant dense<0.000000e+00> : vector<2x128xf32>
    %129 = tpu.matmul %128, %2, %cst_24 {dimension_numbers = #tpu.dot_dimension_numbers<[1], [0], [0], [1], [0, 0, 1, 1], [], []>} : vector<2x32xbf16>, vector<32x128xbf16>, vector<2x128xf32> -> vector<2x128xf32>
    %130 = arith.addf %127, %129 : vector<2x128xf32>
    %131 = arith.addf %130, %9 : vector<2x128xf32>
    %132 = vector.extract_strided_slice %131 {offsets = [0, 0], sizes = [2, 96], strides = [1, 1]} : vector<2x128xf32> to vector<2x96xf32>
    %133 = arith.negf %132 : vector<2x96xf32>
    %134 = math.exp %133 : vector<2x96xf32>
    %cst_25 = arith.constant 1.000000e+00 : f32
    %135 = vector.broadcast %cst_25 : f32 to vector<2x96xf32>
    %136 = arith.addf %135, %134 : vector<2x96xf32>
    %137 = arith.divf %135, %136 : vector<2x96xf32>
    %138 = vector.extract_strided_slice %131 {offsets = [0, 96], sizes = [2, 32], strides = [1, 1]} : vector<2x128xf32> to vector<2x32xf32>
    %139 = math.tanh %138 : vector<2x32xf32>
    %140 = vector.extract_strided_slice %137 {offsets = [0, 0], sizes = [2, 32], strides = [1, 1]} : vector<2x96xf32> to vector<2x32xf32>
    %141 = vector.extract_strided_slice %137 {offsets = [0, 32], sizes = [2, 32], strides = [1, 1]} : vector<2x96xf32> to vector<2x32xf32>
    %142 = vector.extract_strided_slice %137 {offsets = [0, 64], sizes = [2, 32], strides = [1, 1]} : vector<2x96xf32> to vector<2x32xf32>
    %143 = arith.mulf %141, %102 : vector<2x32xf32>
    %144 = arith.mulf %140, %139 : vector<2x32xf32>
    %145 = arith.addf %143, %144 : vector<2x32xf32>
    %146 = math.tanh %145 : vector<2x32xf32>
    %147 = arith.mulf %142, %146 : vector<2x32xf32>
    %148 = vector.extract_strided_slice %17 {offsets = [0, 3, 0], sizes = [2, 1, 128], strides = [1, 1, 1]} : vector<2x8x128xf32> to vector<2x1x128xf32>
    %149 = vector.shape_cast %148 : vector<2x1x128xf32> to vector<2x128xf32>
    %150 = arith.truncf %125 : vector<2x32xf32> to vector<2x32xbf16>
    %cst_26 = arith.constant dense<0.000000e+00> : vector<2x128xf32>
    %151 = tpu.matmul %150, %1, %cst_26 {dimension_numbers = #tpu.dot_dimension_numbers<[1], [0], [0], [1], [0, 0, 1, 1], [], []>} : vector<2x32xbf16>, vector<32x128xbf16>, vector<2x128xf32> -> vector<2x128xf32>
    %152 = arith.addf %149, %151 : vector<2x128xf32>
    %153 = vector.extract_strided_slice %152 {offsets = [0, 0], sizes = [2, 96], strides = [1, 1]} : vector<2x128xf32> to vector<2x96xf32>
    %154 = arith.negf %153 : vector<2x96xf32>
    %155 = math.exp %154 : vector<2x96xf32>
    %cst_27 = arith.constant 1.000000e+00 : f32
    %156 = vector.broadcast %cst_27 : f32 to vector<2x96xf32>
    %157 = arith.addf %156, %155 : vector<2x96xf32>
    %158 = arith.divf %156, %157 : vector<2x96xf32>
    %159 = vector.extract_strided_slice %152 {offsets = [0, 96], sizes = [2, 32], strides = [1, 1]} : vector<2x128xf32> to vector<2x32xf32>
    %160 = math.tanh %159 : vector<2x32xf32>
    %161 = vector.extract_strided_slice %158 {offsets = [0, 0], sizes = [2, 32], strides = [1, 1]} : vector<2x96xf32> to vector<2x32xf32>
    %162 = vector.extract_strided_slice %158 {offsets = [0, 32], sizes = [2, 32], strides = [1, 1]} : vector<2x96xf32> to vector<2x32xf32>
    %163 = vector.extract_strided_slice %158 {offsets = [0, 64], sizes = [2, 32], strides = [1, 1]} : vector<2x96xf32> to vector<2x32xf32>
    %164 = arith.mulf %162, %123 : vector<2x32xf32>
    %165 = arith.mulf %161, %160 : vector<2x32xf32>
    %166 = arith.addf %164, %165 : vector<2x32xf32>
    %167 = math.tanh %166 : vector<2x32xf32>
    %168 = arith.mulf %163, %167 : vector<2x32xf32>
    %169 = arith.truncf %147 : vector<2x32xf32> to vector<2x32xbf16>
    %cst_28 = arith.constant dense<0.000000e+00> : vector<2x128xf32>
    %170 = tpu.matmul %169, %3, %cst_28 {dimension_numbers = #tpu.dot_dimension_numbers<[1], [0], [0], [1], [0, 0, 1, 1], [], []>} : vector<2x32xbf16>, vector<32x128xbf16>, vector<2x128xf32> -> vector<2x128xf32>
    %171 = arith.truncf %168 : vector<2x32xf32> to vector<2x32xbf16>
    %cst_29 = arith.constant dense<0.000000e+00> : vector<2x128xf32>
    %172 = tpu.matmul %171, %2, %cst_29 {dimension_numbers = #tpu.dot_dimension_numbers<[1], [0], [0], [1], [0, 0, 1, 1], [], []>} : vector<2x32xbf16>, vector<32x128xbf16>, vector<2x128xf32> -> vector<2x128xf32>
    %173 = arith.addf %170, %172 : vector<2x128xf32>
    %174 = arith.addf %173, %9 : vector<2x128xf32>
    %175 = vector.extract_strided_slice %174 {offsets = [0, 0], sizes = [2, 96], strides = [1, 1]} : vector<2x128xf32> to vector<2x96xf32>
    %176 = arith.negf %175 : vector<2x96xf32>
    %177 = math.exp %176 : vector<2x96xf32>
    %cst_30 = arith.constant 1.000000e+00 : f32
    %178 = vector.broadcast %cst_30 : f32 to vector<2x96xf32>
    %179 = arith.addf %178, %177 : vector<2x96xf32>
    %180 = arith.divf %178, %179 : vector<2x96xf32>
    %181 = vector.extract_strided_slice %174 {offsets = [0, 96], sizes = [2, 32], strides = [1, 1]} : vector<2x128xf32> to vector<2x32xf32>
    %182 = math.tanh %181 : vector<2x32xf32>
    %183 = vector.extract_strided_slice %180 {offsets = [0, 0], sizes = [2, 32], strides = [1, 1]} : vector<2x96xf32> to vector<2x32xf32>
    %184 = vector.extract_strided_slice %180 {offsets = [0, 32], sizes = [2, 32], strides = [1, 1]} : vector<2x96xf32> to vector<2x32xf32>
    %185 = vector.extract_strided_slice %180 {offsets = [0, 64], sizes = [2, 32], strides = [1, 1]} : vector<2x96xf32> to vector<2x32xf32>
    %186 = arith.mulf %184, %145 : vector<2x32xf32>
    %187 = arith.mulf %183, %182 : vector<2x32xf32>
    %188 = arith.addf %186, %187 : vector<2x32xf32>
    %189 = math.tanh %188 : vector<2x32xf32>
    %190 = arith.mulf %185, %189 : vector<2x32xf32>
    %191 = vector.extract_strided_slice %17 {offsets = [0, 4, 0], sizes = [2, 1, 128], strides = [1, 1, 1]} : vector<2x8x128xf32> to vector<2x1x128xf32>
    %192 = vector.shape_cast %191 : vector<2x1x128xf32> to vector<2x128xf32>
    %193 = arith.truncf %168 : vector<2x32xf32> to vector<2x32xbf16>
    %cst_31 = arith.constant dense<0.000000e+00> : vector<2x128xf32>
    %194 = tpu.matmul %193, %1, %cst_31 {dimension_numbers = #tpu.dot_dimension_numbers<[1], [0], [0], [1], [0, 0, 1, 1], [], []>} : vector<2x32xbf16>, vector<32x128xbf16>, vector<2x128xf32> -> vector<2x128xf32>
    %195 = arith.addf %192, %194 : vector<2x128xf32>
    %196 = vector.extract_strided_slice %195 {offsets = [0, 0], sizes = [2, 96], strides = [1, 1]} : vector<2x128xf32> to vector<2x96xf32>
    %197 = arith.negf %196 : vector<2x96xf32>
    %198 = math.exp %197 : vector<2x96xf32>
    %cst_32 = arith.constant 1.000000e+00 : f32
    %199 = vector.broadcast %cst_32 : f32 to vector<2x96xf32>
    %200 = arith.addf %199, %198 : vector<2x96xf32>
    %201 = arith.divf %199, %200 : vector<2x96xf32>
    %202 = vector.extract_strided_slice %195 {offsets = [0, 96], sizes = [2, 32], strides = [1, 1]} : vector<2x128xf32> to vector<2x32xf32>
    %203 = math.tanh %202 : vector<2x32xf32>
    %204 = vector.extract_strided_slice %201 {offsets = [0, 0], sizes = [2, 32], strides = [1, 1]} : vector<2x96xf32> to vector<2x32xf32>
    %205 = vector.extract_strided_slice %201 {offsets = [0, 32], sizes = [2, 32], strides = [1, 1]} : vector<2x96xf32> to vector<2x32xf32>
    %206 = vector.extract_strided_slice %201 {offsets = [0, 64], sizes = [2, 32], strides = [1, 1]} : vector<2x96xf32> to vector<2x32xf32>
    %207 = arith.mulf %205, %166 : vector<2x32xf32>
    %208 = arith.mulf %204, %203 : vector<2x32xf32>
    %209 = arith.addf %207, %208 : vector<2x32xf32>
    %210 = math.tanh %209 : vector<2x32xf32>
    %211 = arith.mulf %206, %210 : vector<2x32xf32>
    %212 = arith.truncf %190 : vector<2x32xf32> to vector<2x32xbf16>
    %cst_33 = arith.constant dense<0.000000e+00> : vector<2x128xf32>
    %213 = tpu.matmul %212, %3, %cst_33 {dimension_numbers = #tpu.dot_dimension_numbers<[1], [0], [0], [1], [0, 0, 1, 1], [], []>} : vector<2x32xbf16>, vector<32x128xbf16>, vector<2x128xf32> -> vector<2x128xf32>
    %214 = arith.truncf %211 : vector<2x32xf32> to vector<2x32xbf16>
    %cst_34 = arith.constant dense<0.000000e+00> : vector<2x128xf32>
    %215 = tpu.matmul %214, %2, %cst_34 {dimension_numbers = #tpu.dot_dimension_numbers<[1], [0], [0], [1], [0, 0, 1, 1], [], []>} : vector<2x32xbf16>, vector<32x128xbf16>, vector<2x128xf32> -> vector<2x128xf32>
    %216 = arith.addf %213, %215 : vector<2x128xf32>
    %217 = arith.addf %216, %9 : vector<2x128xf32>
    %218 = vector.extract_strided_slice %217 {offsets = [0, 0], sizes = [2, 96], strides = [1, 1]} : vector<2x128xf32> to vector<2x96xf32>
    %219 = arith.negf %218 : vector<2x96xf32>
    %220 = math.exp %219 : vector<2x96xf32>
    %cst_35 = arith.constant 1.000000e+00 : f32
    %221 = vector.broadcast %cst_35 : f32 to vector<2x96xf32>
    %222 = arith.addf %221, %220 : vector<2x96xf32>
    %223 = arith.divf %221, %222 : vector<2x96xf32>
    %224 = vector.extract_strided_slice %217 {offsets = [0, 96], sizes = [2, 32], strides = [1, 1]} : vector<2x128xf32> to vector<2x32xf32>
    %225 = math.tanh %224 : vector<2x32xf32>
    %226 = vector.extract_strided_slice %223 {offsets = [0, 0], sizes = [2, 32], strides = [1, 1]} : vector<2x96xf32> to vector<2x32xf32>
    %227 = vector.extract_strided_slice %223 {offsets = [0, 32], sizes = [2, 32], strides = [1, 1]} : vector<2x96xf32> to vector<2x32xf32>
    %228 = vector.extract_strided_slice %223 {offsets = [0, 64], sizes = [2, 32], strides = [1, 1]} : vector<2x96xf32> to vector<2x32xf32>
    %229 = arith.mulf %227, %188 : vector<2x32xf32>
    %230 = arith.mulf %226, %225 : vector<2x32xf32>
    %231 = arith.addf %229, %230 : vector<2x32xf32>
    %232 = math.tanh %231 : vector<2x32xf32>
    %233 = arith.mulf %228, %232 : vector<2x32xf32>
    %234 = vector.extract_strided_slice %17 {offsets = [0, 5, 0], sizes = [2, 1, 128], strides = [1, 1, 1]} : vector<2x8x128xf32> to vector<2x1x128xf32>
    %235 = vector.shape_cast %234 : vector<2x1x128xf32> to vector<2x128xf32>
    %236 = arith.truncf %211 : vector<2x32xf32> to vector<2x32xbf16>
    %cst_36 = arith.constant dense<0.000000e+00> : vector<2x128xf32>
    %237 = tpu.matmul %236, %1, %cst_36 {dimension_numbers = #tpu.dot_dimension_numbers<[1], [0], [0], [1], [0, 0, 1, 1], [], []>} : vector<2x32xbf16>, vector<32x128xbf16>, vector<2x128xf32> -> vector<2x128xf32>
    %238 = arith.addf %235, %237 : vector<2x128xf32>
    %239 = vector.extract_strided_slice %238 {offsets = [0, 0], sizes = [2, 96], strides = [1, 1]} : vector<2x128xf32> to vector<2x96xf32>
    %240 = arith.negf %239 : vector<2x96xf32>
    %241 = math.exp %240 : vector<2x96xf32>
    %cst_37 = arith.constant 1.000000e+00 : f32
    %242 = vector.broadcast %cst_37 : f32 to vector<2x96xf32>
    %243 = arith.addf %242, %241 : vector<2x96xf32>
    %244 = arith.divf %242, %243 : vector<2x96xf32>
    %245 = vector.extract_strided_slice %238 {offsets = [0, 96], sizes = [2, 32], strides = [1, 1]} : vector<2x128xf32> to vector<2x32xf32>
    %246 = math.tanh %245 : vector<2x32xf32>
    %247 = vector.extract_strided_slice %244 {offsets = [0, 0], sizes = [2, 32], strides = [1, 1]} : vector<2x96xf32> to vector<2x32xf32>
    %248 = vector.extract_strided_slice %244 {offsets = [0, 32], sizes = [2, 32], strides = [1, 1]} : vector<2x96xf32> to vector<2x32xf32>
    %249 = vector.extract_strided_slice %244 {offsets = [0, 64], sizes = [2, 32], strides = [1, 1]} : vector<2x96xf32> to vector<2x32xf32>
    %250 = arith.mulf %248, %209 : vector<2x32xf32>
    %251 = arith.mulf %247, %246 : vector<2x32xf32>
    %252 = arith.addf %250, %251 : vector<2x32xf32>
    %253 = math.tanh %252 : vector<2x32xf32>
    %254 = arith.mulf %249, %253 : vector<2x32xf32>
    %255 = arith.truncf %233 : vector<2x32xf32> to vector<2x32xbf16>
    %cst_38 = arith.constant dense<0.000000e+00> : vector<2x128xf32>
    %256 = tpu.matmul %255, %3, %cst_38 {dimension_numbers = #tpu.dot_dimension_numbers<[1], [0], [0], [1], [0, 0, 1, 1], [], []>} : vector<2x32xbf16>, vector<32x128xbf16>, vector<2x128xf32> -> vector<2x128xf32>
    %257 = arith.truncf %254 : vector<2x32xf32> to vector<2x32xbf16>
    %cst_39 = arith.constant dense<0.000000e+00> : vector<2x128xf32>
    %258 = tpu.matmul %257, %2, %cst_39 {dimension_numbers = #tpu.dot_dimension_numbers<[1], [0], [0], [1], [0, 0, 1, 1], [], []>} : vector<2x32xbf16>, vector<32x128xbf16>, vector<2x128xf32> -> vector<2x128xf32>
    %259 = arith.addf %256, %258 : vector<2x128xf32>
    %260 = arith.addf %259, %9 : vector<2x128xf32>
    %261 = vector.extract_strided_slice %260 {offsets = [0, 0], sizes = [2, 96], strides = [1, 1]} : vector<2x128xf32> to vector<2x96xf32>
    %262 = arith.negf %261 : vector<2x96xf32>
    %263 = math.exp %262 : vector<2x96xf32>
    %cst_40 = arith.constant 1.000000e+00 : f32
    %264 = vector.broadcast %cst_40 : f32 to vector<2x96xf32>
    %265 = arith.addf %264, %263 : vector<2x96xf32>
    %266 = arith.divf %264, %265 : vector<2x96xf32>
    %267 = vector.extract_strided_slice %260 {offsets = [0, 96], sizes = [2, 32], strides = [1, 1]} : vector<2x128xf32> to vector<2x32xf32>
    %268 = math.tanh %267 : vector<2x32xf32>
    %269 = vector.extract_strided_slice %266 {offsets = [0, 0], sizes = [2, 32], strides = [1, 1]} : vector<2x96xf32> to vector<2x32xf32>
    %270 = vector.extract_strided_slice %266 {offsets = [0, 32], sizes = [2, 32], strides = [1, 1]} : vector<2x96xf32> to vector<2x32xf32>
    %271 = vector.extract_strided_slice %266 {offsets = [0, 64], sizes = [2, 32], strides = [1, 1]} : vector<2x96xf32> to vector<2x32xf32>
    %272 = arith.mulf %270, %231 : vector<2x32xf32>
    %273 = arith.mulf %269, %268 : vector<2x32xf32>
    %274 = arith.addf %272, %273 : vector<2x32xf32>
    %275 = math.tanh %274 : vector<2x32xf32>
    %276 = arith.mulf %271, %275 : vector<2x32xf32>
    %277 = vector.extract_strided_slice %17 {offsets = [0, 6, 0], sizes = [2, 1, 128], strides = [1, 1, 1]} : vector<2x8x128xf32> to vector<2x1x128xf32>
    %278 = vector.shape_cast %277 : vector<2x1x128xf32> to vector<2x128xf32>
    %279 = arith.truncf %254 : vector<2x32xf32> to vector<2x32xbf16>
    %cst_41 = arith.constant dense<0.000000e+00> : vector<2x128xf32>
    %280 = tpu.matmul %279, %1, %cst_41 {dimension_numbers = #tpu.dot_dimension_numbers<[1], [0], [0], [1], [0, 0, 1, 1], [], []>} : vector<2x32xbf16>, vector<32x128xbf16>, vector<2x128xf32> -> vector<2x128xf32>
    %281 = arith.addf %278, %280 : vector<2x128xf32>
    %282 = vector.extract_strided_slice %281 {offsets = [0, 0], sizes = [2, 96], strides = [1, 1]} : vector<2x128xf32> to vector<2x96xf32>
    %283 = arith.negf %282 : vector<2x96xf32>
    %284 = math.exp %283 : vector<2x96xf32>
    %cst_42 = arith.constant 1.000000e+00 : f32
    %285 = vector.broadcast %cst_42 : f32 to vector<2x96xf32>
    %286 = arith.addf %285, %284 : vector<2x96xf32>
    %287 = arith.divf %285, %286 : vector<2x96xf32>
    %288 = vector.extract_strided_slice %281 {offsets = [0, 96], sizes = [2, 32], strides = [1, 1]} : vector<2x128xf32> to vector<2x32xf32>
    %289 = math.tanh %288 : vector<2x32xf32>
    %290 = vector.extract_strided_slice %287 {offsets = [0, 0], sizes = [2, 32], strides = [1, 1]} : vector<2x96xf32> to vector<2x32xf32>
    %291 = vector.extract_strided_slice %287 {offsets = [0, 32], sizes = [2, 32], strides = [1, 1]} : vector<2x96xf32> to vector<2x32xf32>
    %292 = vector.extract_strided_slice %287 {offsets = [0, 64], sizes = [2, 32], strides = [1, 1]} : vector<2x96xf32> to vector<2x32xf32>
    %293 = arith.mulf %291, %252 : vector<2x32xf32>
    %294 = arith.mulf %290, %289 : vector<2x32xf32>
    %295 = arith.addf %293, %294 : vector<2x32xf32>
    %296 = math.tanh %295 : vector<2x32xf32>
    %297 = arith.mulf %292, %296 : vector<2x32xf32>
    %298 = arith.truncf %276 : vector<2x32xf32> to vector<2x32xbf16>
    %cst_43 = arith.constant dense<0.000000e+00> : vector<2x128xf32>
    %299 = tpu.matmul %298, %3, %cst_43 {dimension_numbers = #tpu.dot_dimension_numbers<[1], [0], [0], [1], [0, 0, 1, 1], [], []>} : vector<2x32xbf16>, vector<32x128xbf16>, vector<2x128xf32> -> vector<2x128xf32>
    %300 = arith.truncf %297 : vector<2x32xf32> to vector<2x32xbf16>
    %cst_44 = arith.constant dense<0.000000e+00> : vector<2x128xf32>
    %301 = tpu.matmul %300, %2, %cst_44 {dimension_numbers = #tpu.dot_dimension_numbers<[1], [0], [0], [1], [0, 0, 1, 1], [], []>} : vector<2x32xbf16>, vector<32x128xbf16>, vector<2x128xf32> -> vector<2x128xf32>
    %302 = arith.addf %299, %301 : vector<2x128xf32>
    %303 = arith.addf %302, %9 : vector<2x128xf32>
    %304 = vector.extract_strided_slice %303 {offsets = [0, 0], sizes = [2, 96], strides = [1, 1]} : vector<2x128xf32> to vector<2x96xf32>
    %305 = arith.negf %304 : vector<2x96xf32>
    %306 = math.exp %305 : vector<2x96xf32>
    %cst_45 = arith.constant 1.000000e+00 : f32
    %307 = vector.broadcast %cst_45 : f32 to vector<2x96xf32>
    %308 = arith.addf %307, %306 : vector<2x96xf32>
    %309 = arith.divf %307, %308 : vector<2x96xf32>
    %310 = vector.extract_strided_slice %303 {offsets = [0, 96], sizes = [2, 32], strides = [1, 1]} : vector<2x128xf32> to vector<2x32xf32>
    %311 = math.tanh %310 : vector<2x32xf32>
    %312 = vector.extract_strided_slice %309 {offsets = [0, 0], sizes = [2, 32], strides = [1, 1]} : vector<2x96xf32> to vector<2x32xf32>
    %313 = vector.extract_strided_slice %309 {offsets = [0, 32], sizes = [2, 32], strides = [1, 1]} : vector<2x96xf32> to vector<2x32xf32>
    %314 = vector.extract_strided_slice %309 {offsets = [0, 64], sizes = [2, 32], strides = [1, 1]} : vector<2x96xf32> to vector<2x32xf32>
    %315 = arith.mulf %313, %274 : vector<2x32xf32>
    %316 = arith.mulf %312, %311 : vector<2x32xf32>
    %317 = arith.addf %315, %316 : vector<2x32xf32>
    %318 = math.tanh %317 : vector<2x32xf32>
    %319 = arith.mulf %314, %318 : vector<2x32xf32>
    %320 = vector.extract_strided_slice %17 {offsets = [0, 7, 0], sizes = [2, 1, 128], strides = [1, 1, 1]} : vector<2x8x128xf32> to vector<2x1x128xf32>
    %321 = vector.shape_cast %320 : vector<2x1x128xf32> to vector<2x128xf32>
    %322 = arith.truncf %297 : vector<2x32xf32> to vector<2x32xbf16>
    %cst_46 = arith.constant dense<0.000000e+00> : vector<2x128xf32>
    %323 = tpu.matmul %322, %1, %cst_46 {dimension_numbers = #tpu.dot_dimension_numbers<[1], [0], [0], [1], [0, 0, 1, 1], [], []>} : vector<2x32xbf16>, vector<32x128xbf16>, vector<2x128xf32> -> vector<2x128xf32>
    %324 = arith.addf %321, %323 : vector<2x128xf32>
    %325 = vector.extract_strided_slice %324 {offsets = [0, 0], sizes = [2, 96], strides = [1, 1]} : vector<2x128xf32> to vector<2x96xf32>
    %326 = arith.negf %325 : vector<2x96xf32>
    %327 = math.exp %326 : vector<2x96xf32>
    %cst_47 = arith.constant 1.000000e+00 : f32
    %328 = vector.broadcast %cst_47 : f32 to vector<2x96xf32>
    %329 = arith.addf %328, %327 : vector<2x96xf32>
    %330 = arith.divf %328, %329 : vector<2x96xf32>
    %331 = vector.extract_strided_slice %324 {offsets = [0, 96], sizes = [2, 32], strides = [1, 1]} : vector<2x128xf32> to vector<2x32xf32>
    %332 = math.tanh %331 : vector<2x32xf32>
    %333 = vector.extract_strided_slice %330 {offsets = [0, 0], sizes = [2, 32], strides = [1, 1]} : vector<2x96xf32> to vector<2x32xf32>
    %334 = vector.extract_strided_slice %330 {offsets = [0, 32], sizes = [2, 32], strides = [1, 1]} : vector<2x96xf32> to vector<2x32xf32>
    %335 = vector.extract_strided_slice %330 {offsets = [0, 64], sizes = [2, 32], strides = [1, 1]} : vector<2x96xf32> to vector<2x32xf32>
    %336 = arith.mulf %334, %295 : vector<2x32xf32>
    %337 = arith.mulf %333, %332 : vector<2x32xf32>
    %338 = arith.addf %336, %337 : vector<2x32xf32>
    %339 = math.tanh %338 : vector<2x32xf32>
    %340 = arith.mulf %335, %339 : vector<2x32xf32>
    %341 = arith.truncf %319 : vector<2x32xf32> to vector<2x32xbf16>
    %cst_48 = arith.constant dense<0.000000e+00> : vector<2x128xf32>
    %342 = tpu.matmul %341, %3, %cst_48 {dimension_numbers = #tpu.dot_dimension_numbers<[1], [0], [0], [1], [0, 0, 1, 1], [], []>} : vector<2x32xbf16>, vector<32x128xbf16>, vector<2x128xf32> -> vector<2x128xf32>
    %343 = arith.truncf %340 : vector<2x32xf32> to vector<2x32xbf16>
    %cst_49 = arith.constant dense<0.000000e+00> : vector<2x128xf32>
    %344 = tpu.matmul %343, %2, %cst_49 {dimension_numbers = #tpu.dot_dimension_numbers<[1], [0], [0], [1], [0, 0, 1, 1], [], []>} : vector<2x32xbf16>, vector<32x128xbf16>, vector<2x128xf32> -> vector<2x128xf32>
    %345 = arith.addf %342, %344 : vector<2x128xf32>
    %346 = arith.addf %345, %9 : vector<2x128xf32>
    %347 = vector.extract_strided_slice %346 {offsets = [0, 0], sizes = [2, 96], strides = [1, 1]} : vector<2x128xf32> to vector<2x96xf32>
    %348 = arith.negf %347 : vector<2x96xf32>
    %349 = math.exp %348 : vector<2x96xf32>
    %cst_50 = arith.constant 1.000000e+00 : f32
    %350 = vector.broadcast %cst_50 : f32 to vector<2x96xf32>
    %351 = arith.addf %350, %349 : vector<2x96xf32>
    %352 = arith.divf %350, %351 : vector<2x96xf32>
    %353 = vector.extract_strided_slice %346 {offsets = [0, 96], sizes = [2, 32], strides = [1, 1]} : vector<2x128xf32> to vector<2x32xf32>
    %354 = math.tanh %353 : vector<2x32xf32>
    %355 = vector.extract_strided_slice %352 {offsets = [0, 0], sizes = [2, 32], strides = [1, 1]} : vector<2x96xf32> to vector<2x32xf32>
    %356 = vector.extract_strided_slice %352 {offsets = [0, 32], sizes = [2, 32], strides = [1, 1]} : vector<2x96xf32> to vector<2x32xf32>
    %357 = vector.extract_strided_slice %352 {offsets = [0, 64], sizes = [2, 32], strides = [1, 1]} : vector<2x96xf32> to vector<2x32xf32>
    %358 = arith.mulf %356, %317 : vector<2x32xf32>
    %359 = arith.mulf %355, %354 : vector<2x32xf32>
    %360 = arith.addf %358, %359 : vector<2x32xf32>
    %361 = math.tanh %360 : vector<2x32xf32>
    %362 = arith.mulf %357, %361 : vector<2x32xf32>
    %363 = arith.truncf %362 : vector<2x32xf32> to vector<2x32xbf16>
    %cst_51 = arith.constant dense<0.000000e+00> : vector<2x128xf32>
    %364 = tpu.matmul %363, %4, %cst_51 {dimension_numbers = #tpu.dot_dimension_numbers<[1], [0], [0], [1], [0, 0, 1, 1], [], []>} : vector<2x32xbf16>, vector<32x128xbf16>, vector<2x128xf32> -> vector<2x128xf32>
    %365 = vector.broadcast %10 : vector<1x128xf32> to vector<2x128xf32>
    %366 = arith.addf %364, %365 : vector<2x128xf32>
    %c0_52 = arith.constant 0 : index
    %c0_53 = arith.constant 0 : index
    %367 = vector.load %arg3[%c0_52, %c0_53] : memref<2x128xf32, #tpu.memory_space<vmem>>, vector<2x128xf32>
    tpu.vector_store %arg3[%c0_52, %c0_53], %366 {strides = array<i32>} : memref<2x128xf32, #tpu.memory_space<vmem>>, vector<2x128xf32>,
    return
  }
}

</mosaic_0001>

<bundles_post_ra>
// kernel: tpu_custom_call.1
= control target key start
LH: loop header
LB: loop body
LE: loop exit
PB: predicated region body
PF: predicated region fallthrough
CT: control target
= control target key end

     0   :  { %8 = vsyncpa [#allocation3], 0  ;;  %s3216_s0 = inlined_call_operand.hbm [shape: f32[2,8,64], index: 0, kind: input, shape index: {}]   ;;  %s3217_s1 = inlined_call_operand.hbm [shape: bf16[192,128], index: 1, kind: input, shape index: {}]   ;;  %s3218_s2 = inlined_call_operand.vmem [shape: f32[3,128], index: 2, kind: input, shape index: {}]   ;;  %s3219_s3 = inlined_call_operand.hbm [shape: f32[2,128], index: 3, kind: output, shape index: {}]  }
   0x1   :  { %9 = vsyncpa [#allocation6], 0 }
   0x2   :  { %10 = vsyncpa [#allocation4], 0  ;;  %s2723_s12 = smov [#allocation2]   ;;  %s2651_s16 = scalar_lea.hbm %s3216_s0, 256 }
   0x3   :  { %s16_s13 = sshll.u32 %s2723_s12, 4  ;;  %p2652_p0 = scmp.ne.s32.totalorder %s3216_s0, %s2651_s16  ;;  %s17_s13 = int_to_ptr.vmem [resolvable:$true] %s16_s13 }
   0x4   :  { %p2655_p1 = scmp.lt.u32.totalorder %s2651_s16, %s3216_s0 }
   0x6   :  { %p2657_p2 = pnand %p2655_p1, %p2652_p0 }
   0x8   :  { %2660 = shalt.err (!%p2657_p2)
}
   0x9   :  { %s2661_s21 = scalar_lea.vmem %s17_s13, 256  ;;  %p2666_p4 = scmp.lt.s32.totalorder %s17_s13, %s17_s13 }
   0xa   :  { %p2662_p3 = scmp.ne.s32.totalorder %s17_s13, %s2661_s21  ;;  %p2667_p5 = scmp.lt.s32.totalorder %s2661_s21, %s2661_s21 }
   0xc   :  { %p2668_p6 = por %p2667_p5, %p2666_p4 }
   0xe   :  { %p2669_p7 = pnand %p2668_p6, %p2662_p3 }
  0x10   :  { %2672 = shalt.err (!%p2669_p7)
}
  0x11   :  { %s2724_s22 = smov 128   ;;  %s2725_s23 = smov 8  }
  0x12   :  { %22 = dma.hbm_to_vmem [thread:$0]  %s3216_s0, 256, %s17_s13, [#allocation3], %s2724_s22, %s2724_s22, %s2725_s23  }
  0x13   :  { %s2726_s26 = smov [#allocation5]   ;;  %s2673_s30 = scalar_lea.hbm %s3217_s1, 1536 }
  0x14   :  { %s28_s27 = sshll.u32 %s2726_s26, 4  ;;  %p2674_p8 = scmp.ne.s32.totalorder %s3217_s1, %s2673_s30  ;;  %s29_s27 = int_to_ptr.vmem [resolvable:$true] %s28_s27 }
  0x15   :  { %p2677_p9 = scmp.lt.u32.totalorder %s2673_s30, %s3217_s1 }
  0x17   :  { %p2679_p10 = pnand %p2677_p9, %p2674_p8 }
  0x19   :  { %2682 = shalt.err (!%p2679_p10)
}
  0x1a   :  { %s2683_s8 = scalar_lea.vmem %s29_s27, 1536  ;;  %p2688_p12 = scmp.lt.s32.totalorder %s29_s27, %s29_s27 }
  0x1b   :  { %p2684_p11 = scmp.ne.s32.totalorder %s29_s27, %s2683_s8  ;;  %p2689_p13 = scmp.lt.s32.totalorder %s2683_s8, %s2683_s8 }
  0x1d   :  { %p2690_p0 = por %p2689_p13, %p2688_p12 }
  0x1f   :  { %p2691_p1 = pnand %p2690_p0, %p2684_p11 }
  0x21   :  { %2694 = shalt.err (!%p2691_p1)
}
  0x22   :  { %s2727_s0 = smov 64   ;;  %s2728_s9 = smov 4  }
  0x23   :  { %34 = dma.hbm_to_vmem [thread:$0]  %s3217_s1, 1536, %s29_s27, [#allocation6], %s2727_s0, %s2727_s0, %s2728_s9  }
  0x24   :  { %2717 = dma.done.wait [#allocation3], 256  }
  0x25   :  { %2718 = vsyncadd [#allocation3], 4294967040 }
  0x26   :  { %2719 = dma.done.wait [#allocation6], 1536  }
  0x27   :  { %2720 = vsyncadd [#allocation6], 4294965760  ;;  %v2729_v0 = vmov 0.0   ;;  %vm2730_vm0 = vmmov 0   ;;  %v2440_v1 = vld [vmem:[#allocation5] sm:$0xff]   ;;  %v2441_v2 = vld [vmem:[#allocation5 + $0x8] sm:$0xff]   ;;  %v69_v11 = vlaneseq }
  0x28   :  { %2217 = vmatprep.subr.bf16.mxu0 %v2729_v0  ;;  %2229 = vmatprep.subr.bf16.mxu1 %v2729_v0  ;;  %v2786_v3 = vld [vmem:[#allocation5 + $0x20] sm:$0xff]   ;;  %v2790_v4 = vld [vmem:[#allocation5 + $0x28] sm:$0xff]   ;;  %v2443_v5 = vld [vmem:[#allocation5 + $0x10] sm:$0xff]   ;;  %v2731_v9 = vmov 0   ;;  %vm104_vm1 = vcmask 523264   ;;  %s2732_s13 = smov 32  }
  0x29   :  { %2233 = vmatprep.mubr.msk.bf16.mxu1 %vm2730_vm0, %v2729_v0  ;;  %2225 = vmatprep.mubr.msk.bf16.mxu0 %vm2730_vm0, %v2729_v0  ;;  %v2445_v6 = vld [vmem:[#allocation5 + $0x18] sm:$0xff]   ;;  %v73_v7 = vld [vmem:[#allocation2] sm:$0xff]  ;;  %v2803_v12 = vshrl.u32 %v69_v11, 7  ;;  %v2831_v51 = vld [vmem:[#allocation5 + $0x40] sm:$0xff]   ;;  %vm266_vm2 = vcmask 1041409   ;;  %vm161_vm3 = vcmask 261120  }
  0x2a   :  { %2218 = vmatpush3.bf16.msra.mxu0 %v2440_v1  ;;  %2230 = vmatpush3.bf16.msra.mxu1 %v2786_v3  ;;  %v74_v8 = vld [vmem:[#allocation2 + $0x8] sm:$0xff]  ;;  %v2809_v16 = vld [vmem:[%s3218_s2] sm:$0x7]  ;;  %v2837_v53 = vld [vmem:[#allocation5 + $0x48] sm:$0xff]   ;;  %s2733_s16 = smov [#allocation7]  }
  0x2b   :  { %2219 = vmatprep.subr.bf16.mxu0 %v2729_v0  ;;  %2231 = vmatprep.subr.bf16.mxu1 %v2729_v0  ;;  %v75_v10 = vpack.c.bf16 %v74_v8, %v73_v7  ;;  %v78_v14 = vsub.s32 0, %v2803_v12  ;;  %v2829_v50 = vld [vmem:[#allocation5 + $0x30] sm:$0xff]   ;;  %v2835_v52 = vld [vmem:[#allocation5 + $0x38] sm:$0xff]   ;;  %s2067_s17 = sshll.u32 %s2733_s16, 4  ;;  %s2068_s17 = int_to_ptr.vmem [resolvable:$true] %s2067_s17 }
  0x2c   :  { %s2695_s18 = scalar_lea.vmem %s2068_s17, 32  ;;  %p2700_p3 = scmp.lt.s32.totalorder %s2068_s17, %s2068_s17 }
  0x2d   :  { %v79_v19 = vrot.slane %v2809_v16, %v78_v14  ;;  %p2696_p2 = scmp.ne.s32.totalorder %s2068_s17, %s2695_s18  ;;  %p2701_p4 = scmp.lt.s32.totalorder %s2695_s18, %s2695_s18 }
  0x2e   :  { %2220 = vmatpush3.bf16.msra.mxu0 %v2441_v2  ;;  %2232 = vmatpush3.bf16.msra.mxu1 %v2790_v4 }
  0x2f   :  { %2221 = vmatprep.subr.bf16.mxu0 %v2729_v0  ;;  %2237 = vmatprep.subr.bf16.mxu1 %v2729_v0  ;;  %p2702_p5 = por %p2701_p4, %p2700_p3 }
  0x31   :  { %2234 = vmatmul.mubr.bf16.vlgmr.msra.gmra.mrb[0].mxu1 %v2731_v9  ;;  %p2703_p6 = pnand %p2702_p5, %p2696_p2 }
  0x32   :  { %2222 = vmatpush3.bf16.msra.mxu0 %v2443_v5  ;;  %2241 = vmatprep.mubr.msk.bf16.mxu1 %vm2730_vm0, %v2729_v0 }
  0x33   :  { %2223 = vmatprep.subr.bf16.mxu0 %v2729_v0  ;;  %2238 = vmatpush3.bf16.msra.mxu1 %v2829_v50 }
  0x34   :  { %2239 = vmatprep.subr.bf16.mxu1 %v2729_v0 }
  0x36   :  { %2224 = vmatpush3.bf16.msra.mxu0 %v2445_v6 }
  0x37   :  { %2245 = vmatprep.subr.bf16.mxu0 %v2729_v0  ;;  %2240 = vmatpush3.bf16.msra.mxu1 %v2835_v52 }
  0x38   :  { %2253 = vmatprep.subr.bf16.mxu1 %v2729_v0 }
  0x39   :  { %2226 = vmatmul.mubr.msk.bf16.vlgmr.msra.gmra.mrb[0].mxu0 %vm104_vm1, %v75_v10 }
  0x3a   :  { %2249 = vmatprep.mubr.msk.bf16.mxu0 %vm2730_vm0, %v2729_v0  ;;  %2246 = vmatpush3.bf16.msra.mxu0 %v2831_v51 }
  0x3b   :  { %2247 = vmatprep.subr.bf16.mxu0 %v2729_v0 }
  0x3e   :  { %2248 = vmatpush3.bf16.msra.mxu0 %v2837_v53 }
  0x3f   :  { %2261 = vmatprep.subr.bf16.mxu0 %v2729_v0 }
  0x41   :  { %2250 = vmatmul.mubr.bf16.vlgmr.msra.gmra.mrb[4].mxu0 %v2731_v9 }
  0x42   :  { %2262 = vmatpush3.bf16.msra.mxu0 %v2829_v50  ;;  %2265 = vmatprep.mubr.msk.bf16.mxu0 %vm2730_vm0, %v2729_v0 }
  0x43   :  { %2263 = vmatprep.subr.bf16.mxu0 %v2729_v0 }
  0x46   :  { %2264 = vmatpush3.bf16.msra.mxu0 %v2835_v52 }
  0x47   :  { %2277 = vmatprep.subr.bf16.mxu0 %v2729_v0 }
 0x104   :  { %v199_v13 = vpop.f32.mrb[0].mxu1 }
 0x105   :  { %v2235_v15 = vpop.f32.mrb[1].mxu1  ;;  %v206_v21 = vrot.slane %v199_v13, 1 }
 0x106   :  { %v202_v17 = vpop.f32.mrb[2].mxu1 }
 0x107   :  { %v2236_v18 = vpop.f32.mrb[3].mxu1 }
 0x10c   :  { %v142_v20 = vpop.f32.mrb[0].mxu0 }
 0x10d   :  { %v2227_v22 = vpop.f32.mrb[1].mxu0  ;;  %v2812_v24 = vadd.f32 %v142_v20, %v79_v19 }
 0x10e   :  { %v145_v23 = vpop.f32.mrb[2].mxu0 }
 0x10f   :  { %v2814_v25 = vadd.f32 %v145_v23, %v79_v19  ;;  %v2228_v26 = vpop.f32.mrb[3].mxu0  ;;  %v209_v28 = vadd.f32 %v199_v13, %v2812_v24 }
 0x111   :  { %v210_v27 = vadd.f32 %v206_v21, %v2814_v25  ;;  %v2084_v32 = vmul.f32 -1.442695, %v209_v28 }
 0x113   :  { %2452 = vtanh.f32 %v210_v27  ;;  %v2085_v31 = vmul.f32 -1.442695, %v210_v27 }
 0x114   :  { %2454 = vtanh.f32 %v209_v28  ;;  %v372_v6 = vpop.f32.mrb[4].mxu0 }
 0x115   :  { %2456 = vpow2.f32 %v2085_v31  ;;  %v2251_v7 = vpop.f32.mrb[5].mxu0 }
 0x116   :  { %2458 = vpow2.f32 %v2084_v32  ;;  %v375_v8 = vpop.f32.mrb[6].mxu0 }
 0x117   :  { %v2252_v9 = vpop.f32.mrb[7].mxu0 }
 0x11d   :  { %v2453_v29 = vpop.eup %2452 }
 0x11e   :  { %231 = vrot.lane.b32.xlu0 %v2453_v29, %s2732_s13  ;;  %v2455_v30 = vpop.eup %2454 }
 0x11f   :  { %v2457_v33 = vpop.eup %2456 }
 0x120   :  { %v218_v34 = vadd.f32 1.0, %v2457_v33  ;;  %v2459_v35 = vpop.eup %2458  ;;  %v71_v33 = vsub.s32 1, %v2803_v12 }
 0x121   :  { %v217_v36 = vadd.f32 1.0, %v2459_v35 }
 0x122   :  { %229 = vrot.lane.b32.xlu0 %v2455_v30, %s2732_s13  ;;  %2460 = vrcp.f32 %v218_v34  ;;  %v2875_v35 = vrot.slane %v2809_v16, %v71_v33 }
 0x123   :  { %2462 = vrcp.f32 %v217_v36 }
 0x12c   :  { %v2461_v37 = vpop.eup %2460 }
 0x12d   :  { %v2463_v40 = vpop.eup %2462  ;;  %v226_v43 = vmul.f32 0.0, %v2461_v37 }
 0x12e   :  { %v225_v46 = vmul.f32 0.0, %v2463_v40 }
 0x190   :  { %v232_v38 = vpop.permute.xlu0 %231 }
 0x191   :  { %v236_v39 = vmul.f32 %v2461_v37, %v232_v38 }
 0x193   :  { %241 = vrot.lane.b32.xlu1 %v236_v39, %s2732_s13 }
 0x194   :  { %v230_v41 = vpop.permute.xlu0 %229 }
 0x195   :  { %v235_v42 = vmul.f32 %v2463_v40, %v230_v41 }
 0x197   :  { %239 = vrot.lane.b32.xlu1 %v235_v42, %s2732_s13 }
 0x205   :  { %v242_v44 = vpop.permute.xlu1 %241 }
 0x206   :  { %v2822_v45 = vadd.f32 %v242_v44, %v226_v43 }
 0x208   :  { %2464 = vtanh.f32 %v2822_v45  ;;  %v466_v16 = vrot.slane %v2822_v45, 7 }
 0x209   :  { %v240_v47 = vpop.permute.xlu1 %239 }
 0x20a   :  { %v2825_v48 = vadd.f32 %v240_v47, %v225_v46 }
 0x20c   :  { %2466 = vtanh.f32 %v2825_v48  ;;  %v465_v47 = vrot.slane %v2825_v48, 7 }
 0x212   :  { %v2465_v49 = vpop.eup %2464 }
 0x213   :  { %253 = vrot.lane.b32.xlu0 %v2465_v49, %s2732_s13 }
 0x216   :  { %v2467_v54 = vpop.eup %2466 }
 0x217   :  { %251 = vrot.lane.b32.xlu1 %v2467_v54, %s2732_s13 }
 0x285   :  { %v254_v55 = vpop.permute.xlu0 %253 }
 0x286   :  { %v258_v56 = vmul.f32 %v2461_v37, %v254_v55 }
 0x288   :  { %v260_v57 = vpack.c.bf16 %v258_v56, %v258_v56 }
 0x289   :  { %v252_v58 = vpop.permute.xlu1 %251 }
 0x28a   :  { %v264_v59 = vunpack.c.l.b16 %v260_v57  ;;  %v257_v60 = vmul.f32 %v2463_v40, %v252_v58 }
 0x28c   :  { %v259_v61 = vpack.c.bf16 %v257_v60, %v257_v60  ;;  %v265_v62 = vrot.slane %v264_v59, 7 }
 0x28e   :  { %v263_v63 = vunpack.c.l.b16 %v259_v61 }
 0x290   :  { %v267_v1 = vsel %vm266_vm2, %v265_v62, %v263_v63 }
 0x291   :  { %v268_v2 = vpack.c.b16 %v267_v1, %v267_v1 }
 0x293   :  { %269 = vrot.lane.b32.xlu0 %v268_v2, %s2727_s0 }
 0x305   :  { %v270_v5 = vpop.permute.xlu0 %269 }
 0x306   :  { %2242 = vmatmul.mubr.msk.bf16.vlgmr.msra.gmra.mrb[4].mxu1 %vm161_vm3, %v270_v5 }
 0x307   :  { %2254 = vmatpush3.bf16.msra.mxu1 %v2786_v3  ;;  %2257 = vmatprep.mubr.msk.bf16.mxu1 %vm2730_vm0, %v2729_v0 }
 0x308   :  { %2255 = vmatprep.subr.bf16.mxu1 %v2729_v0 }
 0x30b   :  { %2256 = vmatpush3.bf16.msra.mxu1 %v2790_v4 }
 0x30c   :  { %2269 = vmatprep.subr.bf16.mxu1 %v2729_v0 }
 0x30e   :  { %2258 = vmatmul.mubr.msk.bf16.vlgmr.msra.gmra.mrb[8].mxu1 %vm161_vm3, %v270_v5 }
 0x30f   :  { %2270 = vmatpush3.bf16.msra.mxu1 %v2831_v51  ;;  %2273 = vmatprep.mubr.msk.bf16.mxu1 %vm2730_vm0, %v2729_v0 }
 0x310   :  { %2271 = vmatprep.subr.bf16.mxu1 %v2729_v0 }
 0x313   :  { %2272 = vmatpush3.bf16.msra.mxu1 %v2837_v53 }
 0x314   :  { %2285 = vmatprep.subr.bf16.mxu1 %v2729_v0 }
 0x3d9   :  { %v320_v10 = vpop.f32.mrb[4].mxu1 }
 0x3da   :  { %v373_v11 = vadd.f32 %v372_v6, %v320_v10  ;;  %v2243_v13 = vpop.f32.mrb[5].mxu1 }
 0x3db   :  { %v323_v14 = vpop.f32.mrb[6].mxu1 }
 0x3dc   :  { %v2244_v15 = vpop.f32.mrb[7].mxu1  ;;  %v378_v36 = vadd.f32 %v373_v11, %v2875_v35 }
 0x3de   :  { %v2091_v44 = vmul.f32 -1.442695, %v378_v36 }
 0x3e1   :  { %v437_v17 = vpop.f32.mrb[8].mxu1 }
 0x3e2   :  { %v444_v18 = vrot.slane %v437_v17, 7  ;;  %v448_v19 = vadd.f32 %v437_v17, %v2814_v25  ;;  %v2259_v20 = vpop.f32.mrb[9].mxu1 }
 0x3e3   :  { %v440_v21 = vpop.f32.mrb[10].mxu1 }
 0x3e4   :  { %v447_v22 = vadd.f32 %v444_v18, %v2812_v24  ;;  %2468 = vtanh.f32 %v448_v19  ;;  %v2260_v23 = vpop.f32.mrb[11].mxu1  ;;  %v2094_v28 = vmul.f32 -1.442695, %v448_v19 }
 0x3e6   :  { %2470 = vtanh.f32 %v447_v22  ;;  %v2093_v29 = vmul.f32 -1.442695, %v447_v22 }
 0x3e7   :  { %2472 = vpow2.f32 %v2094_v28 }
 0x3e8   :  { %2474 = vpow2.f32 %v2093_v29 }
 0x3ee   :  { %v2469_v26 = vpop.eup %2468 }
 0x3ef   :  { %475 = vrot.lane.b32.xlu0 %v2469_v26, %s2732_s13 }
 0x3f0   :  { %v2471_v27 = vpop.eup %2470 }
 0x3f1   :  { %473 = vrot.lane.b32.xlu1 %v2471_v27, %s2732_s13  ;;  %v2473_v30 = vpop.eup %2472 }
 0x3f2   :  { %v2475_v31 = vpop.eup %2474  ;;  %v456_v32 = vadd.f32 1.0, %v2473_v30 }
 0x3f3   :  { %v455_v34 = vadd.f32 1.0, %v2475_v31 }
 0x3f4   :  { %2476 = vrcp.f32 %v456_v32 }
 0x3f5   :  { %2478 = vrcp.f32 %v455_v34 }
 0x3f6   :  { %2480 = vtanh.f32 %v378_v36 }
 0x3f7   :  { %2482 = vpow2.f32 %v2091_v44 }
 0x3fe   :  { %v2477_v37 = vpop.eup %2476 }
 0x3ff   :  { %v2479_v40 = vpop.eup %2478  ;;  %v470_v46 = vmul.f32 %v2477_v37, %v466_v16 }
 0x400   :  { %v2481_v43 = vpop.eup %2480  ;;  %v469_v56 = vmul.f32 %v2479_v40, %v465_v47 }
 0x401   :  { %v2483_v54 = vpop.eup %2482 }
 0x402   :  { %v382_v58 = vadd.f32 1.0, %v2483_v54 }
 0x461   :  { %v476_v38 = vpop.permute.xlu0 %475 }
 0x462   :  { %v480_v39 = vmul.f32 %v2477_v37, %v476_v38 }
 0x463   :  { %v474_v41 = vpop.permute.xlu1 %473 }
 0x464   :  { %485 = vrot.lane.b32.xlu0 %v480_v39, %s2732_s13  ;;  %v479_v42 = vmul.f32 %v2479_v40, %v474_v41 }
 0x466   :  { %483 = vrot.lane.b32.xlu1 %v479_v42, %s2732_s13 }
 0x46a   :  { %388 = vrot.lane.b32.xlu1 %v2481_v43, %s2732_s13 }
 0x4d6   :  { %v486_v49 = vpop.permute.xlu0 %485 }
 0x4d7   :  { %v2883_v55 = vadd.f32 %v486_v49, %v470_v46 }
 0x4d8   :  { %v484_v57 = vpop.permute.xlu1 %483 }
 0x4d9   :  { %2484 = vtanh.f32 %v2883_v55  ;;  %v2886_v59 = vadd.f32 %v484_v57, %v469_v56 }
 0x4db   :  { %2486 = vtanh.f32 %v2886_v59 }
 0x4dc   :  { %2488 = vrcp.f32 %v382_v58  ;;  %v389_v61 = vpop.permute.xlu1 %388 }
 0x4e3   :  { %v2485_v60 = vpop.eup %2484 }
 0x4e4   :  { %497 = vrot.lane.b32.xlu1 %v2485_v60, %s2732_s13 }
 0x4e5   :  { %v2487_v45 = vpop.eup %2486 }
 0x4e6   :  { %495 = vrot.lane.b32.xlu0 %v2487_v45, %s2732_s13  ;;  %v2489_v48 = vpop.eup %2488 }
 0x4e7   :  { %v391_v62 = vmul.f32 %v2489_v48, %v389_v61  ;;  %v386_v8 = vmul.f32 0.0, %v2489_v48 }
 0x4ea   :  { %393 = vrot.lane.b32.xlu0 %v391_v62, %s2732_s13 }
 0x556   :  { %v498_v63 = vpop.permute.xlu1 %497 }
 0x557   :  { %v502_v1 = vmul.f32 %v2477_v37, %v498_v63 }
 0x558   :  { %v496_v2 = vpop.permute.xlu0 %495 }
 0x559   :  { %v501_v5 = vmul.f32 %v2479_v40, %v496_v2  ;;  %v505_v6 = vpack.c.bf16 %v502_v1, %v502_v1 }
 0x55b   :  { %v504_v7 = vpack.c.bf16 %v501_v5, %v501_v5  ;;  %v509_v13 = vunpack.c.l.b16 %v505_v6  ;;  %v692_v5 = vrot.slane %v2886_v59, 7 }
 0x55c   :  { %v394_v9 = vpop.permute.xlu0 %393 }
 0x55d   :  { %v508_v10 = vunpack.c.l.b16 %v504_v7  ;;  %v2892_v11 = vadd.f32 %v394_v9, %v386_v8  ;;  %v693_v7 = vrot.slane %v2883_v55, 7 }
 0x55f   :  { %v510_v14 = vrot.slane %v508_v10, 1  ;;  %2490 = vtanh.f32 %v2892_v11 }
 0x561   :  { %v511_v15 = vsel %vm266_vm2, %v509_v13, %v510_v14 }
 0x562   :  { %v512_v17 = vpack.c.b16 %v511_v15, %v511_v15 }
 0x564   :  { %513 = vrot.lane.b32.xlu1 %v512_v17, %s2727_s0 }
 0x569   :  { %v2491_v18 = vpop.eup %2490 }
 0x56a   :  { %399 = vrot.lane.b32.xlu0 %v2491_v18, %s2732_s13 }
 0x5d6   :  { %v514_v19 = vpop.permute.xlu1 %513 }
 0x5d7   :  { %2266 = vmatmul.mubr.msk.bf16.vlgmr.msra.gmra.mrb[8].mxu0 %vm161_vm3, %v514_v19 }
 0x5d8   :  { %2278 = vmatpush3.bf16.msra.mxu0 %v2786_v3  ;;  %2281 = vmatprep.mubr.msk.bf16.mxu0 %vm2730_vm0, %v2729_v0 }
 0x5d9   :  { %2279 = vmatprep.subr.bf16.mxu0 %v2729_v0 }
 0x5dc   :  { %2280 = vmatpush3.bf16.msra.mxu0 %v2790_v4  ;;  %v400_v20 = vpop.permute.xlu0 %399 }
 0x5dd   :  { %v402_v21 = vmul.f32 %v2489_v48, %v400_v20  ;;  %2293 = vmatprep.subr.bf16.mxu0 %v2729_v0 }
 0x5df   :  { %v503_v22 = vpack.c.bf16 %v402_v21, %v402_v21  ;;  %2282 = vmatmul.mubr.msk.bf16.vlgmr.msra.gmra.mrb[12].mxu0 %vm161_vm3, %v514_v19 }
 0x5e0   :  { %2294 = vmatpush3.bf16.msra.mxu0 %v2831_v51  ;;  %2297 = vmatprep.mubr.msk.bf16.mxu0 %vm2730_vm0, %v2729_v0 }
 0x5e1   :  { %559 = vrot.lane.b32.xlu1 %v503_v22, %s2727_s0  ;;  %2295 = vmatprep.subr.bf16.mxu0 %v2729_v0 }
 0x5e4   :  { %2296 = vmatpush3.bf16.msra.mxu0 %v2837_v53 }
 0x5e5   :  { %2309 = vmatprep.subr.bf16.mxu0 %v2729_v0 }
 0x653   :  { %v560_v23 = vpop.permute.xlu1 %559 }
 0x654   :  { %2274 = vmatmul.mubr.msk.bf16.vlgmr.msra.gmra.mrb[12].mxu1 %vm161_vm3, %v560_v23 }
 0x655   :  { %2286 = vmatpush3.bf16.msra.mxu1 %v2829_v50  ;;  %2289 = vmatprep.mubr.msk.bf16.mxu1 %vm2730_vm0, %v2729_v0 }
 0x656   :  { %2287 = vmatprep.subr.bf16.mxu1 %v2729_v0 }
 0x659   :  { %2288 = vmatpush3.bf16.msra.mxu1 %v2835_v52 }
 0x65a   :  { %2301 = vmatprep.subr.bf16.mxu1 %v2729_v0 }
 0x6aa   :  { %v552_v26 = vpop.f32.mrb[8].mxu0 }
 0x6ab   :  { %v2267_v27 = vpop.f32.mrb[9].mxu0 }
 0x6ac   :  { %v555_v28 = vpop.f32.mrb[10].mxu0 }
 0x6ad   :  { %v2268_v29 = vpop.f32.mrb[11].mxu0 }
 0x6b2   :  { %v663_v30 = vpop.f32.mrb[12].mxu0 }
 0x6b3   :  { %v670_v31 = vrot.slane %v663_v30, 6  ;;  %v671_v32 = vrot.slane %v663_v30, 7  ;;  %v2283_v33 = vpop.f32.mrb[13].mxu0 }
 0x6b4   :  { %v666_v34 = vpop.f32.mrb[14].mxu0 }
 0x6b5   :  { %v674_v36 = vadd.f32 %v670_v31, %v2812_v24  ;;  %v675_v37 = vadd.f32 %v671_v32, %v2814_v25  ;;  %v2284_v38 = vpop.f32.mrb[15].mxu0 }
 0x6b7   :  { %2492 = vtanh.f32 %v674_v36  ;;  %v2099_v41 = vmul.f32 -1.442695, %v674_v36  ;;  %v2100_v42 = vmul.f32 -1.442695, %v675_v37 }
 0x6b8   :  { %2494 = vtanh.f32 %v675_v37 }
 0x6b9   :  { %2496 = vpow2.f32 %v2099_v41 }
 0x6ba   :  { %2498 = vpow2.f32 %v2100_v42 }
 0x6c1   :  { %v2493_v39 = vpop.eup %2492 }
 0x6c2   :  { %v2495_v40 = vpop.eup %2494  ;;  %700 = vrot.lane.b32.xlu0 %v2493_v39, %s2732_s13 }
 0x6c3   :  { %702 = vrot.lane.b32.xlu1 %v2495_v40, %s2732_s13  ;;  %v2497_v43 = vpop.eup %2496 }
 0x6c4   :  { %v2499_v44 = vpop.eup %2498  ;;  %v682_v16 = vadd.f32 1.0, %v2497_v43 }
 0x6c5   :  { %v683_v46 = vadd.f32 1.0, %v2499_v44 }
 0x6c6   :  { %2500 = vrcp.f32 %v682_v16 }
 0x6c7   :  { %2502 = vrcp.f32 %v683_v46 }
 0x6d0   :  { %v2501_v60 = vpop.eup %2500 }
 0x6d1   :  { %v2503_v61 = vpop.eup %2502  ;;  %v696_v8 = vmul.f32 %v2501_v60, %v692_v5 }
 0x6d2   :  { %v697_v9 = vmul.f32 %v2503_v61, %v693_v7 }
 0x727   :  { %v598_v47 = vpop.f32.mrb[12].mxu1 }
 0x728   :  { %v599_v49 = vadd.f32 %v598_v47, %v552_v26  ;;  %v2275_v54 = vpop.f32.mrb[13].mxu1 }
 0x729   :  { %v601_v56 = vpop.f32.mrb[14].mxu1 }
 0x72a   :  { %v2276_v57 = vpop.f32.mrb[15].mxu1  ;;  %v604_v58 = vadd.f32 %v599_v49, %v2875_v35 }
 0x72c   :  { %2504 = vtanh.f32 %v604_v58  ;;  %v2097_v2 = vmul.f32 -1.442695, %v604_v58 }
 0x72e   :  { %2506 = vpow2.f32 %v2097_v2 }
 0x734   :  { %v701_v45 = vpop.permute.xlu0 %700 }
 0x735   :  { %v703_v48 = vpop.permute.xlu1 %702  ;;  %v706_v62 = vmul.f32 %v2501_v60, %v701_v45 }
 0x736   :  { %v707_v63 = vmul.f32 %v2503_v61, %v703_v48  ;;  %v2505_v1 = vpop.eup %2504 }
 0x737   :  { %710 = vrot.lane.b32.xlu0 %v706_v62, %s2732_s13 }
 0x738   :  { %712 = vrot.lane.b32.xlu1 %v707_v63, %s2732_s13  ;;  %v2507_v6 = vpop.eup %2506 }
 0x739   :  { %v608_v13 = vadd.f32 1.0, %v2507_v6 }
 0x73b   :  { %614 = vrot.lane.b32.xlu0 %v2505_v1, %s2732_s13 }
 0x7a9   :  { %v711_v10 = vpop.permute.xlu0 %710 }
 0x7aa   :  { %v713_v14 = vpop.permute.xlu1 %712  ;;  %v2930_v15 = vadd.f32 %v711_v10, %v696_v8 }
 0x7ab   :  { %v2932_v17 = vadd.f32 %v713_v14, %v697_v9 }
 0x7ac   :  { %2508 = vtanh.f32 %v2930_v15 }
 0x7ad   :  { %2510 = vtanh.f32 %v2932_v17  ;;  %v615_v19 = vpop.permute.xlu0 %614 }
 0x7ae   :  { %2512 = vrcp.f32 %v608_v13 }
 0x7b6   :  { %v2509_v18 = vpop.eup %2508 }
 0x7b7   :  { %v2511_v59 = vpop.eup %2510  ;;  %722 = vrot.lane.b32.xlu1 %v2509_v18, %s2732_s13 }
 0x7b8   :  { %v2513_v55 = vpop.eup %2512  ;;  %724 = vrot.lane.b32.xlu0 %v2511_v59, %s2732_s13 }
 0x7b9   :  { %v617_v20 = vmul.f32 %v2513_v55, %v615_v19  ;;  %v612_v28 = vmul.f32 %v2513_v55, %v2892_v11 }
 0x7bb   :  { %619 = vrot.lane.b32.xlu1 %v617_v20, %s2732_s13 }
 0x829   :  { %v723_v21 = vpop.permute.xlu1 %722 }
 0x82a   :  { %v725_v22 = vpop.permute.xlu0 %724  ;;  %v728_v23 = vmul.f32 %v2501_v60, %v723_v21 }
 0x82b   :  { %v729_v26 = vmul.f32 %v2503_v61, %v725_v22 }
 0x82c   :  { %v731_v27 = vpack.c.bf16 %v728_v23, %v728_v23 }
 0x82d   :  { %v732_v29 = vpack.c.bf16 %v729_v26, %v729_v26  ;;  %v620_v30 = vpop.permute.xlu1 %619 }
 0x82e   :  { %v735_v31 = vunpack.c.l.b16 %v731_v27  ;;  %v2940_v32 = vadd.f32 %v620_v30, %v612_v28  ;;  %v921_v30 = vrot.slane %v2932_v17, 7 }
 0x82f   :  { %v736_v33 = vunpack.c.l.b16 %v732_v29  ;;  %v920_v29 = vrot.slane %v2930_v15, 7 }
 0x830   :  { %v737_v34 = vrot.slane %v735_v31, 2  ;;  %2514 = vtanh.f32 %v2940_v32 }
 0x831   :  { %v738_v36 = vrot.slane %v736_v33, 1 }
 0x833   :  { %v739_v37 = vsel %vm266_vm2, %v738_v36, %v737_v34 }
 0x834   :  { %v740_v38 = vpack.c.b16 %v739_v37, %v739_v37 }
 0x836   :  { %741 = vrot.lane.b32.xlu0 %v740_v38, %s2727_s0 }
 0x83a   :  { %v2515_v39 = vpop.eup %2514 }
 0x83b   :  { %625 = vrot.lane.b32.xlu1 %v2515_v39, %s2732_s13 }
 0x8a8   :  { %v742_v40 = vpop.permute.xlu0 %741 }
 0x8a9   :  { %2290 = vmatmul.mubr.msk.bf16.vlgmr.msra.gmra.mrb[16].mxu1 %vm161_vm3, %v742_v40 }
 0x8aa   :  { %2302 = vmatpush3.bf16.msra.mxu1 %v2786_v3  ;;  %2305 = vmatprep.mubr.msk.bf16.mxu1 %vm2730_vm0, %v2729_v0 }
 0x8ab   :  { %2303 = vmatprep.subr.bf16.mxu1 %v2729_v0 }
 0x8ad   :  { %v626_v11 = vpop.permute.xlu1 %625 }
 0x8ae   :  { %2304 = vmatpush3.bf16.msra.mxu1 %v2790_v4  ;;  %v628_v41 = vmul.f32 %v2513_v55, %v626_v11 }
 0x8af   :  { %2317 = vmatprep.subr.bf16.mxu1 %v2729_v0 }
 0x8b0   :  { %v730_v42 = vpack.c.bf16 %v628_v41, %v628_v41 }
 0x8b1   :  { %2306 = vmatmul.mubr.msk.bf16.vlgmr.msra.gmra.mrb[20].mxu1 %vm161_vm3, %v742_v40 }
 0x8b2   :  { %787 = vrot.lane.b32.xlu0 %v730_v42, %s2727_s0  ;;  %2318 = vmatpush3.bf16.msra.mxu1 %v2831_v51 }
 0x8b3   :  { %2319 = vmatprep.subr.bf16.mxu1 %v2729_v0  ;;  %2321 = vmatprep.mubr.msk.bf16.mxu1 %vm2730_vm0, %v2729_v0 }
 0x8b6   :  { %2320 = vmatpush3.bf16.msra.mxu1 %v2837_v53 }
 0x8b7   :  { %2333 = vmatprep.subr.bf16.mxu1 %v2729_v0 }
 0x924   :  { %v788_v43 = vpop.permute.xlu0 %787 }
 0x925   :  { %2298 = vmatmul.mubr.msk.bf16.vlgmr.msra.gmra.mrb[16].mxu0 %vm161_vm3, %v788_v43 }
 0x926   :  { %2310 = vmatpush3.bf16.msra.mxu0 %v2829_v50  ;;  %2313 = vmatprep.mubr.msk.bf16.mxu0 %vm2730_vm0, %v2729_v0 }
 0x927   :  { %2311 = vmatprep.subr.bf16.mxu0 %v2729_v0 }
 0x92a   :  { %2312 = vmatpush3.bf16.msra.mxu0 %v2835_v52 }
 0x92b   :  { %2325 = vmatprep.subr.bf16.mxu0 %v2729_v0 }
 0x97c   :  { %v780_v44 = vpop.f32.mrb[16].mxu1 }
 0x97d   :  { %v2291_v16 = vpop.f32.mrb[17].mxu1 }
 0x97e   :  { %v783_v46 = vpop.f32.mrb[18].mxu1 }
 0x97f   :  { %v2292_v47 = vpop.f32.mrb[19].mxu1 }
 0x984   :  { %v891_v49 = vpop.f32.mrb[20].mxu1 }
 0x985   :  { %v898_v54 = vrot.slane %v891_v49, 5  ;;  %v899_v56 = vrot.slane %v891_v49, 6  ;;  %v2307_v57 = vpop.f32.mrb[21].mxu1 }
 0x986   :  { %v894_v58 = vpop.f32.mrb[22].mxu1 }
 0x987   :  { %v902_v60 = vadd.f32 %v898_v54, %v2812_v24  ;;  %v903_v45 = vadd.f32 %v899_v56, %v2814_v25  ;;  %v2308_v61 = vpop.f32.mrb[23].mxu1 }
 0x989   :  { %2516 = vtanh.f32 %v902_v60  ;;  %v2105_v63 = vmul.f32 -1.442695, %v902_v60  ;;  %v2106_v1 = vmul.f32 -1.442695, %v903_v45 }
 0x98a   :  { %2518 = vtanh.f32 %v903_v45 }
 0x98b   :  { %2520 = vpow2.f32 %v2105_v63 }
 0x98c   :  { %2522 = vpow2.f32 %v2106_v1 }
 0x993   :  { %v2517_v48 = vpop.eup %2516 }
 0x994   :  { %v2519_v62 = vpop.eup %2518  ;;  %928 = vrot.lane.b32.xlu1 %v2517_v48, %s2732_s13 }
 0x995   :  { %930 = vrot.lane.b32.xlu0 %v2519_v62, %s2732_s13  ;;  %v2521_v2 = vpop.eup %2520 }
 0x996   :  { %v2523_v5 = vpop.eup %2522  ;;  %v910_v6 = vadd.f32 1.0, %v2521_v2 }
 0x997   :  { %v911_v8 = vadd.f32 1.0, %v2523_v5 }
 0x998   :  { %2524 = vrcp.f32 %v910_v6 }
 0x999   :  { %2526 = vrcp.f32 %v911_v8 }
 0x9a2   :  { %v2525_v19 = vpop.eup %2524 }
 0x9a3   :  { %v2527_v55 = vpop.eup %2526  ;;  %v924_v31 = vmul.f32 %v2525_v19, %v920_v29 }
 0x9a4   :  { %v925_v33 = vmul.f32 %v2527_v55, %v921_v30 }
 0x9f8   :  { %v826_v7 = vpop.f32.mrb[16].mxu0 }
 0x9f9   :  { %v827_v9 = vadd.f32 %v826_v7, %v780_v44  ;;  %v2299_v10 = vpop.f32.mrb[17].mxu0 }
 0x9fa   :  { %v829_v13 = vpop.f32.mrb[18].mxu0 }
 0x9fb   :  { %v2300_v14 = vpop.f32.mrb[19].mxu0  ;;  %v832_v18 = vadd.f32 %v827_v9, %v2875_v35 }
 0x9fd   :  { %2528 = vtanh.f32 %v832_v18  ;;  %v2103_v26 = vmul.f32 -1.442695, %v832_v18 }
 0x9ff   :  { %2530 = vpow2.f32 %v2103_v26 }
 0xa06   :  { %v929_v59 = vpop.permute.xlu1 %928 }
 0xa07   :  { %v931_v20 = vpop.permute.xlu0 %930  ;;  %v934_v21 = vmul.f32 %v2525_v19, %v929_v59  ;;  %v2529_v23 = vpop.eup %2528 }
 0xa08   :  { %v935_v22 = vmul.f32 %v2527_v55, %v931_v20 }
 0xa09   :  { %938 = vrot.lane.b32.xlu1 %v934_v21, %s2732_s13  ;;  %v2531_v27 = vpop.eup %2530 }
 0xa0a   :  { %940 = vrot.lane.b32.xlu0 %v935_v22, %s2732_s13  ;;  %v836_v28 = vadd.f32 1.0, %v2531_v27 }
 0xa0c   :  { %2532 = vrcp.f32 %v836_v28 }
 0xa0d   :  { %842 = vrot.lane.b32.xlu1 %v2529_v23, %s2732_s13 }
 0xa16   :  { %v2533_v39 = vpop.eup %2532 }
 0xa17   :  { %v840_v17 = vmul.f32 %v2533_v39, %v2940_v32 }
 0xa7b   :  { %v939_v34 = vpop.permute.xlu1 %938 }
 0xa7c   :  { %v941_v36 = vpop.permute.xlu0 %940  ;;  %v2978_v37 = vadd.f32 %v939_v34, %v924_v31 }
 0xa7d   :  { %v2980_v38 = vadd.f32 %v941_v36, %v925_v33 }
 0xa7e   :  { %2534 = vtanh.f32 %v2978_v37 }
 0xa7f   :  { %2536 = vtanh.f32 %v2980_v38  ;;  %v843_v40 = vpop.permute.xlu1 %842 }
 0xa80   :  { %v845_v11 = vmul.f32 %v2533_v39, %v843_v40 }
 0xa82   :  { %847 = vrot.lane.b32.xlu0 %v845_v11, %s2732_s13 }
 0xa88   :  { %v2535_v15 = vpop.eup %2534 }
 0xa89   :  { %v2537_v41 = vpop.eup %2536  ;;  %950 = vrot.lane.b32.xlu1 %v2535_v15, %s2732_s13 }
 0xa8a   :  { %952 = vrot.lane.b32.xlu0 %v2537_v41, %s2732_s13 }
 0xaf4   :  { %v848_v42 = vpop.permute.xlu0 %847 }
 0xaf5   :  { %v2988_v43 = vadd.f32 %v848_v42, %v840_v17 }
 0xaf7   :  { %2538 = vtanh.f32 %v2988_v43 }
 0xafb   :  { %v951_v44 = vpop.permute.xlu1 %950 }
 0xafc   :  { %v956_v16 = vmul.f32 %v2525_v19, %v951_v44  ;;  %v953_v46 = vpop.permute.xlu0 %952 }
 0xafd   :  { %v957_v47 = vmul.f32 %v2527_v55, %v953_v46 }
 0xafe   :  { %v959_v49 = vpack.c.bf16 %v956_v16, %v956_v16 }
 0xaff   :  { %v960_v54 = vpack.c.bf16 %v957_v47, %v957_v47 }
 0xb00   :  { %v963_v56 = vunpack.c.l.b16 %v959_v49 }
 0xb01   :  { %v2539_v57 = vpop.eup %2538  ;;  %v964_v58 = vunpack.c.l.b16 %v960_v54  ;;  %v1148_v54 = vrot.slane %v2978_v37, 7 }
 0xb02   :  { %v965_v60 = vrot.slane %v963_v56, 3  ;;  %853 = vrot.lane.b32.xlu1 %v2539_v57, %s2732_s13  ;;  %v1149_v56 = vrot.slane %v2980_v38, 7 }
 0xb03   :  { %v966_v45 = vrot.slane %v964_v58, 2 }
 0xb05   :  { %v967_v32 = vsel %vm266_vm2, %v966_v45, %v965_v60 }
 0xb06   :  { %v968_v61 = vpack.c.b16 %v967_v32, %v967_v32 }
 0xb08   :  { %969 = vrot.lane.b32.xlu0 %v968_v61, %s2727_s0 }
 0xb74   :  { %v854_v48 = vpop.permute.xlu1 %853 }
 0xb75   :  { %v856_v62 = vmul.f32 %v2533_v39, %v854_v48 }
 0xb77   :  { %v958_v63 = vpack.c.bf16 %v856_v62, %v856_v62 }
 0xb79   :  { %1015 = vrot.lane.b32.xlu1 %v958_v63, %s2727_s0 }
 0xb7a   :  { %v970_v1 = vpop.permute.xlu0 %969 }
 0xb7b   :  { %2314 = vmatmul.mubr.msk.bf16.vlgmr.msra.gmra.mrb[20].mxu0 %vm161_vm3, %v970_v1 }
 0xb7c   :  { %2326 = vmatpush3.bf16.msra.mxu0 %v2786_v3  ;;  %2329 = vmatprep.mubr.msk.bf16.mxu0 %vm2730_vm0, %v2729_v0 }
 0xb7d   :  { %2327 = vmatprep.subr.bf16.mxu0 %v2729_v0 }
 0xb80   :  { %2328 = vmatpush3.bf16.msra.mxu0 %v2790_v4 }
 0xb81   :  { %2341 = vmatprep.subr.bf16.mxu0 %v2729_v0 }
 0xb83   :  { %2330 = vmatmul.mubr.msk.bf16.vlgmr.msra.gmra.mrb[24].mxu0 %vm161_vm3, %v970_v1 }
 0xb84   :  { %2342 = vmatpush3.bf16.msra.mxu0 %v2831_v51  ;;  %2345 = vmatprep.mubr.msk.bf16.mxu0 %vm2730_vm0, %v2729_v0 }
 0xb85   :  { %2343 = vmatprep.subr.bf16.mxu0 %v2729_v0 }
 0xb88   :  { %2344 = vmatpush3.bf16.msra.mxu0 %v2837_v53 }
 0xb89   :  { %2357 = vmatprep.subr.bf16.mxu0 %v2729_v0 }
 0xbeb   :  { %v1016_v3 = vpop.permute.xlu1 %1015 }
 0xbec   :  { %2322 = vmatmul.mubr.msk.bf16.vlgmr.msra.gmra.mrb[24].mxu1 %vm161_vm3, %v1016_v3 }
 0xbed   :  { %2334 = vmatpush3.bf16.msra.mxu1 %v2829_v50  ;;  %2337 = vmatprep.mubr.msk.bf16.mxu1 %vm2730_vm0, %v2729_v0 }
 0xbee   :  { %2335 = vmatprep.subr.bf16.mxu1 %v2729_v0 }
 0xbf1   :  { %2336 = vmatpush3.bf16.msra.mxu1 %v2835_v52 }
 0xbf2   :  { %2349 = vmatprep.subr.bf16.mxu1 %v2729_v0 }
 0xc4e   :  { %v1008_v4 = vpop.f32.mrb[20].mxu0 }
 0xc4f   :  { %v2315_v2 = vpop.f32.mrb[21].mxu0 }
 0xc50   :  { %v1011_v5 = vpop.f32.mrb[22].mxu0 }
 0xc51   :  { %v2316_v6 = vpop.f32.mrb[23].mxu0 }
 0xc56   :  { %v1119_v7 = vpop.f32.mrb[24].mxu0 }
 0xc57   :  { %v1126_v8 = vrot.slane %v1119_v7, 4  ;;  %v1127_v9 = vrot.slane %v1119_v7, 5  ;;  %v2331_v10 = vpop.f32.mrb[25].mxu0 }
 0xc58   :  { %v1122_v13 = vpop.f32.mrb[26].mxu0 }
 0xc59   :  { %v1130_v14 = vadd.f32 %v1126_v8, %v2812_v24  ;;  %v1131_v18 = vadd.f32 %v1127_v9, %v2814_v25  ;;  %v2332_v19 = vpop.f32.mrb[27].mxu0 }
 0xc5b   :  { %2540 = vtanh.f32 %v1130_v14  ;;  %v2111_v20 = vmul.f32 -1.442695, %v1130_v14  ;;  %v2112_v21 = vmul.f32 -1.442695, %v1131_v18 }
 0xc5c   :  { %2542 = vtanh.f32 %v1131_v18 }
 0xc5d   :  { %2544 = vpow2.f32 %v2111_v20  ;;  %v3044_v20 = vld [vmem:[#allocation5 + $0x20] sm:$0xff]  }
 0xc5e   :  { %2546 = vpow2.f32 %v2112_v21  ;;  %v3050_v21 = vld [vmem:[#allocation5 + $0x28] sm:$0xff]  }
 0xc65   :  { %v2541_v59 = vpop.eup %2540 }
 0xc66   :  { %v2543_v55 = vpop.eup %2542  ;;  %1156 = vrot.lane.b32.xlu0 %v2541_v59, %s2732_s13 }
 0xc67   :  { %1158 = vrot.lane.b32.xlu1 %v2543_v55, %s2732_s13  ;;  %v2545_v30 = vpop.eup %2544 }
 0xc68   :  { %v2547_v31 = vpop.eup %2546  ;;  %v1138_v33 = vadd.f32 1.0, %v2545_v30 }
 0xc69   :  { %v1139_v34 = vadd.f32 1.0, %v2547_v31 }
 0xcbf   :  { %v1054_v22 = vpop.f32.mrb[24].mxu1 }
 0xcc0   :  { %v1055_v23 = vadd.f32 %v1054_v22, %v1008_v4  ;;  %v2323_v26 = vpop.f32.mrb[25].mxu1 }
 0xcc1   :  { %v1057_v27 = vpop.f32.mrb[26].mxu1 }
 0xcc2   :  { %v1060_v28 = vadd.f32 %v1055_v23, %v2875_v35  ;;  %v2324_v29 = vpop.f32.mrb[27].mxu1 }
 0xcc4   :  { %2548 = vtanh.f32 %v1060_v28  ;;  %v2109_v42 = vmul.f32 -1.442695, %v1060_v28 }
 0xcc5   :  { %2550 = vrcp.f32 %v1138_v33 }
 0xcc6   :  { %2552 = vrcp.f32 %v1139_v34 }
 0xcc7   :  { %2554 = vpow2.f32 %v2109_v42 }
 0xcce   :  { %v2549_v36 = vpop.eup %2548 }
 0xccf   :  { %1070 = vrot.lane.b32.xlu0 %v2549_v36, %s2732_s13  ;;  %v2551_v39 = vpop.eup %2550 }
 0xcd0   :  { %v2553_v11 = vpop.eup %2552  ;;  %v1152_v57 = vmul.f32 %v2551_v39, %v1148_v54 }
 0xcd1   :  { %v2555_v44 = vpop.eup %2554  ;;  %v1153_v58 = vmul.f32 %v2553_v11, %v1149_v56 }
 0xcd2   :  { %v1064_v16 = vadd.f32 1.0, %v2555_v44 }
 0xcd4   :  { %2556 = vrcp.f32 %v1064_v16 }
 0xcd8   :  { %v1157_v40 = vpop.permute.xlu0 %1156 }
 0xcd9   :  { %v1159_v15 = vpop.permute.xlu1 %1158  ;;  %v1162_v41 = vmul.f32 %v2551_v39, %v1157_v40 }
 0xcda   :  { %v1163_v17 = vmul.f32 %v2553_v11, %v1159_v15 }
 0xcdb   :  { %1166 = vrot.lane.b32.xlu1 %v1162_v41, %s2732_s13 }
 0xcdc   :  { %1168 = vrot.lane.b32.xlu0 %v1163_v17, %s2732_s13 }
 0xcde   :  { %v2557_v46 = vpop.eup %2556 }
 0xcdf   :  { %v1068_v37 = vmul.f32 %v2557_v46, %v2988_v43 }
 0xd41   :  { %v1071_v47 = vpop.permute.xlu0 %1070 }
 0xd42   :  { %v1073_v49 = vmul.f32 %v2557_v46, %v1071_v47 }
 0xd44   :  { %1075 = vrot.lane.b32.xlu1 %v1073_v49, %s2732_s13 }
 0xd4d   :  { %v1167_v60 = vpop.permute.xlu1 %1166 }
 0xd4e   :  { %v1169_v45 = vpop.permute.xlu0 %1168  ;;  %v3027_v32 = vadd.f32 %v1167_v60, %v1152_v57 }
 0xd4f   :  { %v3029_v61 = vadd.f32 %v1169_v45, %v1153_v58 }
 0xd50   :  { %2558 = vtanh.f32 %v3027_v32 }
 0xd51   :  { %2560 = vtanh.f32 %v3029_v61 }
 0xd5a   :  { %v2559_v48 = vpop.eup %2558 }
 0xd5b   :  { %v2561_v62 = vpop.eup %2560  ;;  %1178 = vrot.lane.b32.xlu0 %v2559_v48, %s2732_s13 }
 0xd5c   :  { %1180 = vrot.lane.b32.xlu1 %v2561_v62, %s2732_s13 }
 0xdb6   :  { %v1076_v38 = vpop.permute.xlu1 %1075 }
 0xdb7   :  { %v3036_v63 = vadd.f32 %v1076_v38, %v1068_v37 }
 0xdb9   :  { %2562 = vtanh.f32 %v3036_v63 }
 0xdc3   :  { %v2563_v1 = vpop.eup %2562 }
 0xdc4   :  { %1081 = vrot.lane.b32.xlu0 %v2563_v1, %s2732_s13 }
 0xdcd   :  { %v1179_v3 = vpop.permute.xlu0 %1178 }
 0xdce   :  { %v1181_v4 = vpop.permute.xlu1 %1180  ;;  %v1184_v2 = vmul.f32 %v2551_v39, %v1179_v3 }
 0xdcf   :  { %v1185_v5 = vmul.f32 %v2553_v11, %v1181_v4 }
 0xdd0   :  { %v1187_v6 = vpack.c.bf16 %v1184_v2, %v1184_v2  ;;  %v1376_v2 = vrot.slane %v3027_v32, 7 }
 0xdd1   :  { %v1188_v7 = vpack.c.bf16 %v1185_v5, %v1185_v5  ;;  %v1377_v5 = vrot.slane %v3029_v61, 7 }
 0xdd2   :  { %v1191_v8 = vunpack.c.l.b16 %v1187_v6 }
 0xdd3   :  { %v1192_v9 = vunpack.c.l.b16 %v1188_v7 }
 0xdd4   :  { %v1193_v10 = vrot.slane %v1191_v8, 4 }
 0xdd5   :  { %v1194_v13 = vrot.slane %v1192_v9, 3 }
 0xdd7   :  { %v1195_v43 = vsel %vm266_vm2, %v1194_v13, %v1193_v10 }
 0xdd8   :  { %v1196_v14 = vpack.c.b16 %v1195_v43, %v1195_v43 }
 0xdda   :  { %1197 = vrot.lane.b32.xlu1 %v1196_v14, %s2727_s0 }
 0xe36   :  { %v1082_v18 = vpop.permute.xlu0 %1081 }
 0xe37   :  { %v1084_v19 = vmul.f32 %v2557_v46, %v1082_v18 }
 0xe39   :  { %v1186_v59 = vpack.c.bf16 %v1084_v19, %v1084_v19 }
 0xe3b   :  { %1243 = vrot.lane.b32.xlu0 %v1186_v59, %s2727_s0 }
 0xe4c   :  { %v1198_v55 = vpop.permute.xlu1 %1197 }
 0xe4d   :  { %2338 = vmatmul.mubr.msk.bf16.vlgmr.msra.gmra.mrb[28].mxu1 %vm161_vm3, %v1198_v55 }
 0xe4e   :  { %2350 = vmatpush3.bf16.msra.mxu1 %v3044_v20  ;;  %2353 = vmatprep.mubr.msk.bf16.mxu1 %vm2730_vm0, %v2729_v0 }
 0xe4f   :  { %2351 = vmatprep.subr.bf16.mxu1 %v2729_v0 }
 0xe52   :  { %2352 = vmatpush3.bf16.msra.mxu1 %v3050_v21 }
 0xe53   :  { %2365 = vmatprep.subr.bf16.mxu1 %v2729_v0 }
 0xe55   :  { %2354 = vmatmul.mubr.msk.bf16.vlgmr.msra.gmra.mrb[32].mxu1 %vm161_vm3, %v1198_v55 }
 0xe56   :  { %2366 = vmatpush3.bf16.msra.mxu1 %v2831_v51  ;;  %2369 = vmatprep.mubr.msk.bf16.mxu1 %vm2730_vm0, %v2729_v0 }
 0xe57   :  { %2367 = vmatprep.subr.bf16.mxu1 %v2729_v0 }
 0xe5a   :  { %2368 = vmatpush3.bf16.msra.mxu1 %v2837_v53 }
 0xe5b   :  { %2381 = vmatprep.subr.bf16.mxu1 %v2729_v0 }
 0xead   :  { %v1244_v22 = vpop.permute.xlu0 %1243 }
 0xeae   :  { %2346 = vmatmul.mubr.msk.bf16.vlgmr.msra.gmra.mrb[28].mxu0 %vm161_vm3, %v1244_v22 }
 0xeaf   :  { %2358 = vmatpush3.bf16.msra.mxu0 %v2829_v50  ;;  %2361 = vmatprep.mubr.msk.bf16.mxu0 %vm2730_vm0, %v2729_v0 }
 0xeb0   :  { %2359 = vmatprep.subr.bf16.mxu0 %v2729_v0 }
 0xeb3   :  { %2360 = vmatpush3.bf16.msra.mxu0 %v2835_v52 }
 0xeb4   :  { %2373 = vmatprep.subr.bf16.mxu0 %v2729_v0 }
 0xf20   :  { %v1236_v51 = vpop.f32.mrb[28].mxu1 }
 0xf21   :  { %v2339_v23 = vpop.f32.mrb[29].mxu1 }
 0xf22   :  { %v1239_v26 = vpop.f32.mrb[30].mxu1 }
 0xf23   :  { %v2340_v53 = vpop.f32.mrb[31].mxu1 }
 0xf28   :  { %v1347_v27 = vpop.f32.mrb[32].mxu1 }
 0xf29   :  { %v1354_v28 = vrot.slane %v1347_v27, 3  ;;  %v1355_v29 = vrot.slane %v1347_v27, 4  ;;  %v2355_v30 = vpop.f32.mrb[33].mxu1 }
 0xf2a   :  { %v1350_v31 = vpop.f32.mrb[34].mxu1 }
 0xf2b   :  { %v1358_v50 = vadd.f32 %v1354_v28, %v2812_v24  ;;  %v1359_v33 = vadd.f32 %v1355_v29, %v2814_v25  ;;  %v2356_v34 = vpop.f32.mrb[35].mxu1 }
 0xf2d   :  { %2564 = vtanh.f32 %v1358_v50  ;;  %v2117_v42 = vmul.f32 -1.442695, %v1358_v50  ;;  %v2118_v44 = vmul.f32 -1.442695, %v1359_v33 }
 0xf2e   :  { %2566 = vtanh.f32 %v1359_v33 }
 0xf37   :  { %v2565_v36 = vpop.eup %2564 }
 0xf38   :  { %v2567_v52 = vpop.eup %2566  ;;  %1384 = vrot.lane.b32.xlu1 %v2565_v36, %s2732_s13  ;;  %v3103_v36 = vld [vmem:[#allocation5 + $0x40] sm:$0xff]  }
 0xf39   :  { %1386 = vrot.lane.b32.xlu0 %v2567_v52, %s2732_s13  ;;  %v3109_v52 = vld [vmem:[#allocation5 + $0x48] sm:$0xff]  }
 0xf81   :  { %v1282_v39 = vpop.f32.mrb[28].mxu0 }
 0xf82   :  { %v1283_v40 = vadd.f32 %v1282_v39, %v1236_v51  ;;  %v2347_v11 = vpop.f32.mrb[29].mxu0 }
 0xf83   :  { %v1285_v15 = vpop.f32.mrb[30].mxu0  ;;  %v3120_v11 = vld [vmem:[#allocation5 + $0x38] sm:$0xff]  }
 0xf84   :  { %v1288_v41 = vadd.f32 %v1283_v40, %v2875_v35  ;;  %v2348_v17 = vpop.f32.mrb[31].mxu0  ;;  %v3114_v40 = vld [vmem:[#allocation5 + $0x30] sm:$0xff]  }
 0xf86   :  { %2568 = vtanh.f32 %v1288_v41  ;;  %v2115_v62 = vmul.f32 -1.442695, %v1288_v41 }
 0xf87   :  { %2570 = vpow2.f32 %v2117_v42 }
 0xf88   :  { %2572 = vpow2.f32 %v2118_v44 }
 0xf90   :  { %v2569_v16 = vpop.eup %2568 }
 0xf91   :  { %1298 = vrot.lane.b32.xlu1 %v2569_v16, %s2732_s13  ;;  %v2571_v46 = vpop.eup %2570 }
 0xf92   :  { %v2573_v47 = vpop.eup %2572  ;;  %v1366_v49 = vadd.f32 1.0, %v2571_v46 }
 0xf93   :  { %v1367_v54 = vadd.f32 1.0, %v2573_v47 }
 0xf94   :  { %2574 = vrcp.f32 %v1366_v49 }
 0xf95   :  { %2576 = vrcp.f32 %v1367_v54 }
 0xf96   :  { %2578 = vpow2.f32 %v2115_v62 }
 0xf9e   :  { %v2575_v56 = vpop.eup %2574 }
 0xf9f   :  { %v2577_v58 = vpop.eup %2576  ;;  %v1380_v6 = vmul.f32 %v2575_v56, %v1376_v2 }
 0xfa0   :  { %v2579_v37 = vpop.eup %2578  ;;  %v1381_v8 = vmul.f32 %v2577_v58, %v1377_v5 }
 0xfa1   :  { %v1292_v38 = vadd.f32 1.0, %v2579_v37 }
 0xfa3   :  { %2580 = vrcp.f32 %v1292_v38 }
 0xfaa   :  { %v1385_v57 = vpop.permute.xlu1 %1384 }
 0xfab   :  { %v1390_v60 = vmul.f32 %v2575_v56, %v1385_v57  ;;  %v1387_v45 = vpop.permute.xlu0 %1386 }
 0xfac   :  { %v1391_v48 = vmul.f32 %v2577_v58, %v1387_v45 }
 0xfad   :  { %1394 = vrot.lane.b32.xlu0 %v1390_v60, %s2732_s13  ;;  %v2581_v1 = vpop.eup %2580 }
 0xfae   :  { %1396 = vrot.lane.b32.xlu1 %v1391_v48, %s2732_s13  ;;  %v1296_v32 = vmul.f32 %v2581_v1, %v3036_v63 }
0x1003   :  { %v1299_v3 = vpop.permute.xlu1 %1298 }
0x1004   :  { %v1301_v4 = vmul.f32 %v2581_v1, %v1299_v3 }
0x1006   :  { %1303 = vrot.lane.b32.xlu0 %v1301_v4, %s2732_s13 }
0x101f   :  { %v1395_v7 = vpop.permute.xlu0 %1394 }
0x1020   :  { %v3079_v9 = vadd.f32 %v1395_v7, %v1380_v6  ;;  %v1397_v10 = vpop.permute.xlu1 %1396 }
0x1021   :  { %v3081_v13 = vadd.f32 %v1397_v10, %v1381_v8 }
0x1022   :  { %2582 = vtanh.f32 %v3079_v9 }
0x1023   :  { %2584 = vtanh.f32 %v3081_v13 }
0x102c   :  { %v2583_v43 = vpop.eup %2582 }
0x102d   :  { %v2585_v14 = vpop.eup %2584  ;;  %1406 = vrot.lane.b32.xlu1 %v2583_v43, %s2732_s13 }
0x102e   :  { %1408 = vrot.lane.b32.xlu0 %v2585_v14, %s2732_s13 }
0x1078   :  { %v1304_v61 = vpop.permute.xlu0 %1303 }
0x1079   :  { %v3088_v18 = vadd.f32 %v1304_v61, %v1296_v32 }
0x107b   :  { %2586 = vtanh.f32 %v3088_v18 }
0x1085   :  { %v2587_v19 = vpop.eup %2586 }
0x1086   :  { %1309 = vrot.lane.b32.xlu1 %v2587_v19, %s2732_s13 }
0x109f   :  { %v1407_v59 = vpop.permute.xlu1 %1406 }
0x10a0   :  { %v1412_v55 = vmul.f32 %v2575_v56, %v1407_v59  ;;  %v1409_v22 = vpop.permute.xlu0 %1408 }
0x10a1   :  { %v1413_v51 = vmul.f32 %v2577_v58, %v1409_v22 }
0x10a2   :  { %v1415_v23 = vpack.c.bf16 %v1412_v55, %v1412_v55 }
0x10a3   :  { %v1416_v26 = vpack.c.bf16 %v1413_v51, %v1413_v51 }
0x10a4   :  { %v1419_v53 = vunpack.c.l.b16 %v1415_v23 }
0x10a5   :  { %v1420_v27 = vunpack.c.l.b16 %v1416_v26 }
0x10a6   :  { %v1421_v28 = vrot.slane %v1419_v53, 5  ;;  %v1604_v53 = vrot.slane %v3079_v9, 7 }
0x10a7   :  { %v1422_v29 = vrot.slane %v1420_v27, 4  ;;  %v1605_v27 = vrot.slane %v3081_v13, 7 }
0x10a9   :  { %v1423_v63 = vsel %vm266_vm2, %v1422_v29, %v1421_v28 }
0x10aa   :  { %v1424_v30 = vpack.c.b16 %v1423_v63, %v1423_v63 }
0x10ac   :  { %1425 = vrot.lane.b32.xlu0 %v1424_v30, %s2727_s0 }
0x10f8   :  { %v1310_v31 = vpop.permute.xlu1 %1309 }
0x10f9   :  { %v1312_v50 = vmul.f32 %v2581_v1, %v1310_v31 }
0x10fb   :  { %v1414_v33 = vpack.c.bf16 %v1312_v50, %v1312_v50 }
0x10fd   :  { %1471 = vrot.lane.b32.xlu1 %v1414_v33, %s2727_s0 }
0x111e   :  { %v1426_v34 = vpop.permute.xlu0 %1425 }
0x111f   :  { %2362 = vmatmul.mubr.msk.bf16.vlgmr.msra.gmra.mrb[32].mxu0 %vm161_vm3, %v1426_v34 }
0x1120   :  { %2374 = vmatpush3.bf16.msra.mxu0 %v3044_v20  ;;  %2377 = vmatprep.mubr.msk.bf16.mxu0 %vm2730_vm0, %v2729_v0 }
0x1121   :  { %2375 = vmatprep.subr.bf16.mxu0 %v2729_v0 }
0x1124   :  { %2376 = vmatpush3.bf16.msra.mxu0 %v3050_v21 }
0x1125   :  { %2389 = vmatprep.subr.bf16.mxu0 %v2729_v0 }
0x1127   :  { %2378 = vmatmul.mubr.msk.bf16.vlgmr.msra.gmra.mrb[36].mxu0 %vm161_vm3, %v1426_v34 }
0x1128   :  { %2390 = vmatpush3.bf16.msra.mxu0 %v3103_v36  ;;  %2393 = vmatprep.mubr.msk.bf16.mxu0 %vm2730_vm0, %v2729_v0 }
0x1129   :  { %2391 = vmatprep.subr.bf16.mxu0 %v2729_v0 }
0x112c   :  { %2392 = vmatpush3.bf16.msra.mxu0 %v3109_v52 }
0x112d   :  { %2405 = vmatprep.subr.bf16.mxu0 %v2729_v0 }
0x116f   :  { %v1472_v39 = vpop.permute.xlu1 %1471 }
0x1170   :  { %2370 = vmatmul.mubr.msk.bf16.vlgmr.msra.gmra.mrb[36].mxu1 %vm161_vm3, %v1472_v39 }
0x1171   :  { %2382 = vmatpush3.bf16.msra.mxu1 %v3114_v40  ;;  %2385 = vmatprep.mubr.msk.bf16.mxu1 %vm2730_vm0, %v2729_v0 }
0x1172   :  { %2383 = vmatprep.subr.bf16.mxu1 %v2729_v0 }
0x1175   :  { %2384 = vmatpush3.bf16.msra.mxu1 %v3120_v11 }
0x1176   :  { %2397 = vmatprep.subr.bf16.mxu1 %v2729_v0 }
0x11f2   :  { %v1464_v15 = vpop.f32.mrb[32].mxu0 }
0x11f3   :  { %v2363_v41 = vpop.f32.mrb[33].mxu0 }
0x11f4   :  { %v1467_v17 = vpop.f32.mrb[34].mxu0 }
0x11f5   :  { %v2364_v42 = vpop.f32.mrb[35].mxu0 }
0x11fa   :  { %v1575_v44 = vpop.f32.mrb[36].mxu0 }
0x11fb   :  { %v1582_v16 = vrot.slane %v1575_v44, 2  ;;  %v1583_v46 = vrot.slane %v1575_v44, 3  ;;  %v2379_v47 = vpop.f32.mrb[37].mxu0 }
0x11fc   :  { %v1578_v49 = vpop.f32.mrb[38].mxu0 }
0x11fd   :  { %v1586_v54 = vadd.f32 %v1582_v16, %v2812_v24  ;;  %v1587_v56 = vadd.f32 %v1583_v46, %v2814_v25  ;;  %v2380_v57 = vpop.f32.mrb[39].mxu0 }
0x11ff   :  { %2588 = vtanh.f32 %v1586_v54  ;;  %v2123_v4 = vmul.f32 -1.442695, %v1586_v54  ;;  %v2124_v2 = vmul.f32 -1.442695, %v1587_v56 }
0x1200   :  { %2590 = vtanh.f32 %v1587_v56 }
0x1209   :  { %v2589_v58 = vpop.eup %2588 }
0x120a   :  { %v2591_v60 = vpop.eup %2590  ;;  %1612 = vrot.lane.b32.xlu0 %v2589_v58, %s2732_s13 }
0x120b   :  { %1614 = vrot.lane.b32.xlu1 %v2591_v60, %s2732_s13 }
0x1243   :  { %v1510_v45 = vpop.f32.mrb[36].mxu1 }
0x1244   :  { %v1511_v48 = vadd.f32 %v1510_v45, %v1464_v15  ;;  %v2371_v62 = vpop.f32.mrb[37].mxu1 }
0x1245   :  { %v1513_v37 = vpop.f32.mrb[38].mxu1 }
0x1246   :  { %v1516_v38 = vadd.f32 %v1511_v48, %v2875_v35  ;;  %v2372_v1 = vpop.f32.mrb[39].mxu1 }
0x1248   :  { %2592 = vtanh.f32 %v1516_v38  ;;  %v2121_v59 = vmul.f32 -1.442695, %v1516_v38 }
0x1249   :  { %2594 = vpow2.f32 %v2123_v4 }
0x124a   :  { %2596 = vpow2.f32 %v2124_v2 }
0x1252   :  { %v2593_v3 = vpop.eup %2592 }
0x1253   :  { %1526 = vrot.lane.b32.xlu0 %v2593_v3, %s2732_s13  ;;  %v2595_v5 = vpop.eup %2594 }
0x1254   :  { %v2597_v6 = vpop.eup %2596  ;;  %v1594_v7 = vadd.f32 1.0, %v2595_v5 }
0x1255   :  { %v1595_v8 = vadd.f32 1.0, %v2597_v6 }
0x1256   :  { %2598 = vrcp.f32 %v1594_v7 }
0x1257   :  { %2600 = vrcp.f32 %v1595_v8 }
0x1258   :  { %2602 = vpow2.f32 %v2121_v59 }
0x1260   :  { %v2599_v10 = vpop.eup %2598 }
0x1261   :  { %v2601_v14 = vpop.eup %2600  ;;  %v1608_v28 = vmul.f32 %v2599_v10, %v1604_v53 }
0x1262   :  { %v2603_v55 = vpop.eup %2602  ;;  %v1609_v29 = vmul.f32 %v2601_v14, %v1605_v27 }
0x1263   :  { %v1520_v22 = vadd.f32 1.0, %v2603_v55 }
0x1265   :  { %2604 = vrcp.f32 %v1520_v22 }
0x126f   :  { %v2605_v51 = vpop.eup %2604 }
0x1270   :  { %v1524_v9 = vmul.f32 %v2605_v51, %v3088_v18 }
0x127c   :  { %v1613_v43 = vpop.permute.xlu0 %1612 }
0x127d   :  { %v1615_v32 = vpop.permute.xlu1 %1614  ;;  %v1618_v61 = vmul.f32 %v2599_v10, %v1613_v43 }
0x127e   :  { %v1619_v19 = vmul.f32 %v2601_v14, %v1615_v32 }
0x127f   :  { %1622 = vrot.lane.b32.xlu1 %v1618_v61, %s2732_s13 }
0x1280   :  { %1624 = vrot.lane.b32.xlu0 %v1619_v19, %s2732_s13 }
0x12c5   :  { %v1527_v23 = vpop.permute.xlu0 %1526 }
0x12c6   :  { %v1529_v26 = vmul.f32 %v2605_v51, %v1527_v23 }
0x12c8   :  { %1531 = vrot.lane.b32.xlu1 %v1529_v26, %s2732_s13 }
0x12f1   :  { %v1623_v63 = vpop.permute.xlu1 %1622 }
0x12f2   :  { %v1625_v30 = vpop.permute.xlu0 %1624  ;;  %v3135_v31 = vadd.f32 %v1623_v63, %v1608_v28 }
0x12f3   :  { %v3137_v50 = vadd.f32 %v1625_v30, %v1609_v29 }
0x12f4   :  { %2606 = vtanh.f32 %v3135_v31 }
0x12f5   :  { %2608 = vtanh.f32 %v3137_v50 }
0x12fe   :  { %v2607_v33 = vpop.eup %2606 }
0x12ff   :  { %v2609_v34 = vpop.eup %2608  ;;  %1634 = vrot.lane.b32.xlu0 %v2607_v33, %s2732_s13 }
0x1300   :  { %1636 = vrot.lane.b32.xlu1 %v2609_v34, %s2732_s13 }
0x133a   :  { %v1532_v13 = vpop.permute.xlu1 %1531 }
0x133b   :  { %v3144_v39 = vadd.f32 %v1532_v13, %v1524_v9  ;;  %v1832_v13 = vrot.slane %v3135_v31, 7 }
0x133d   :  { %2610 = vtanh.f32 %v3144_v39 }
0x1347   :  { %v2611_v15 = vpop.eup %2610 }
0x1348   :  { %1537 = vrot.lane.b32.xlu0 %v2611_v15, %s2732_s13  ;;  %v1833_v15 = vrot.slane %v3137_v50, 7 }
0x1371   :  { %v1635_v41 = vpop.permute.xlu0 %1634 }
0x1372   :  { %v1637_v17 = vpop.permute.xlu1 %1636  ;;  %v1640_v42 = vmul.f32 %v2599_v10, %v1635_v41 }
0x1373   :  { %v1641_v44 = vmul.f32 %v2601_v14, %v1637_v17 }
0x1374   :  { %v1643_v16 = vpack.c.bf16 %v1640_v42, %v1640_v42 }
0x1375   :  { %v1644_v46 = vpack.c.bf16 %v1641_v44, %v1641_v44 }
0x1376   :  { %v1647_v47 = vunpack.c.l.b16 %v1643_v16 }
0x1377   :  { %v1648_v49 = vunpack.c.l.b16 %v1644_v46 }
0x1378   :  { %v1649_v54 = vrot.slane %v1647_v47, 6 }
0x1379   :  { %v1650_v56 = vrot.slane %v1648_v49, 5 }
0x137b   :  { %v1651_v18 = vsel %vm266_vm2, %v1650_v56, %v1649_v54 }
0x137c   :  { %v1652_v57 = vpack.c.b16 %v1651_v18, %v1651_v18 }
0x137e   :  { %1653 = vrot.lane.b32.xlu1 %v1652_v57, %s2727_s0 }
0x13ba   :  { %v1538_v58 = vpop.permute.xlu0 %1537 }
0x13bb   :  { %v1540_v60 = vmul.f32 %v2605_v51, %v1538_v58 }
0x13bd   :  { %v1642_v45 = vpack.c.bf16 %v1540_v60, %v1540_v60 }
0x13bf   :  { %1699 = vrot.lane.b32.xlu0 %v1642_v45, %s2727_s0 }
0x13f0   :  { %v1654_v48 = vpop.permute.xlu1 %1653 }
0x13f1   :  { %2386 = vmatmul.mubr.msk.bf16.vlgmr.msra.gmra.mrb[40].mxu1 %vm161_vm3, %v1654_v48 }
0x13f2   :  { %2398 = vmatpush3.bf16.msra.mxu1 %v3044_v20  ;;  %2401 = vmatprep.mubr.msk.bf16.mxu1 %vm2730_vm0, %v2729_v0 }
0x13f3   :  { %2399 = vmatprep.subr.bf16.mxu1 %v2729_v0 }
0x13f6   :  { %2400 = vmatpush3.bf16.msra.mxu1 %v3050_v21 }
0x13f7   :  { %2413 = vmatprep.subr.bf16.mxu1 %v2729_v0 }
0x13f9   :  { %2402 = vmatmul.mubr.msk.bf16.vlgmr.msra.gmra.mrb[44].mxu1 %vm161_vm3, %v1654_v48 }
0x13fa   :  { %2414 = vmatpush3.bf16.msra.mxu1 %v3103_v36  ;;  %2417 = vmatprep.mubr.msk.bf16.mxu1 %vm2730_vm0, %v2729_v0 }
0x13fb   :  { %2415 = vmatprep.subr.bf16.mxu1 %v2729_v0 }
0x13fe   :  { %2416 = vmatpush3.bf16.msra.mxu1 %v3109_v52 }
0x1431   :  { %v1700_v20 = vpop.permute.xlu0 %1699 }
0x1432   :  { %2394 = vmatmul.mubr.msk.bf16.vlgmr.msra.gmra.mrb[40].mxu0 %vm161_vm3, %v1700_v20 }
0x1433   :  { %2406 = vmatpush3.bf16.msra.mxu0 %v3114_v40  ;;  %2409 = vmatprep.mubr.msk.bf16.mxu0 %vm2730_vm0, %v2729_v0 }
0x1434   :  { %2407 = vmatprep.subr.bf16.mxu0 %v2729_v0 }
0x1437   :  { %2408 = vmatpush3.bf16.msra.mxu0 %v3120_v11 }
0x1438   :  { %2421 = vmatprep.subr.bf16.mxu0 %v2729_v0 }
0x14c4   :  { %v1692_v21 = vpop.f32.mrb[40].mxu1 }
0x14c5   :  { %v2387_v36 = vpop.f32.mrb[41].mxu1 }
0x14c6   :  { %v1695_v62 = vpop.f32.mrb[42].mxu1 }
0x14c7   :  { %v2388_v37 = vpop.f32.mrb[43].mxu1 }
0x14cc   :  { %v1803_v38 = vpop.f32.mrb[44].mxu1 }
0x14cd   :  { %v1810_v52 = vrot.slane %v1803_v38, 1  ;;  %v1811_v1 = vrot.slane %v1803_v38, 2  ;;  %v2403_v3 = vpop.f32.mrb[45].mxu1 }
0x14ce   :  { %v1806_v4 = vpop.f32.mrb[46].mxu1 }
0x14cf   :  { %v1814_v40 = vadd.f32 %v1810_v52, %v2812_v24  ;;  %v1815_v2 = vadd.f32 %v1811_v1, %v2814_v25  ;;  %v2404_v5 = vpop.f32.mrb[47].mxu1 }
0x14d1   :  { %2612 = vtanh.f32 %v1814_v40  ;;  %v2129_v25 = vmul.f32 -1.442695, %v1814_v40  ;;  %v2130_v61 = vmul.f32 -1.442695, %v1815_v2 }
0x14d2   :  { %2614 = vtanh.f32 %v1815_v2 }
0x14db   :  { %v2613_v6 = vpop.eup %2612 }
0x14dc   :  { %v2615_v11 = vpop.eup %2614  ;;  %1840 = vrot.lane.b32.xlu1 %v2613_v6, %s2732_s13 }
0x14dd   :  { %1842 = vrot.lane.b32.xlu0 %v2615_v11, %s2732_s13 }
0x1505   :  { %v1738_v7 = vpop.f32.mrb[40].mxu0 }
0x1506   :  { %v1739_v8 = vadd.f32 %v1738_v7, %v1692_v21  ;;  %v2395_v10 = vpop.f32.mrb[41].mxu0 }
0x1507   :  { %v1741_v43 = vpop.f32.mrb[42].mxu0 }
0x1508   :  { %v1744_v14 = vadd.f32 %v1739_v8, %v2875_v35  ;;  %v2396_v32 = vpop.f32.mrb[43].mxu0 }
0x150a   :  { %2616 = vtanh.f32 %v1744_v14  ;;  %v2127_v29 = vmul.f32 -1.442695, %v1744_v14 }
0x150b   :  { %2618 = vpow2.f32 %v2129_v25 }
0x150c   :  { %2620 = vpow2.f32 %v2130_v61 }
0x1514   :  { %v2617_v24 = vpop.eup %2616 }
0x1515   :  { %1754 = vrot.lane.b32.xlu1 %v2617_v24, %s2732_s13  ;;  %v2619_v19 = vpop.eup %2618 }
0x1516   :  { %v2621_v59 = vpop.eup %2620  ;;  %v1822_v55 = vadd.f32 1.0, %v2619_v19 }
0x1517   :  { %v1823_v22 = vadd.f32 1.0, %v2621_v59 }
0x1518   :  { %2622 = vrcp.f32 %v1822_v55 }
0x1519   :  { %2624 = vrcp.f32 %v1823_v22 }
0x151a   :  { %2626 = vpow2.f32 %v2127_v29 }
0x1522   :  { %v2623_v51 = vpop.eup %2622 }
0x1523   :  { %v2625_v26 = vpop.eup %2624  ;;  %v1836_v41 = vmul.f32 %v2623_v51, %v1832_v13 }
0x1524   :  { %v2627_v63 = vpop.eup %2626  ;;  %v1837_v42 = vmul.f32 %v2625_v26, %v1833_v15 }
0x1525   :  { %v1748_v30 = vadd.f32 1.0, %v2627_v63 }
0x1527   :  { %2628 = vrcp.f32 %v1748_v30  ;;  %v2000_v30 = vsub.s32 2, %v2803_v12 }
0x1531   :  { %v2629_v33 = vpop.eup %2628 }
0x1532   :  { %v1752_v54 = vmul.f32 %v2629_v33, %v3144_v39 }
0x154e   :  { %v1841_v23 = vpop.permute.xlu1 %1840 }
0x154f   :  { %v1846_v53 = vmul.f32 %v2623_v51, %v1841_v23  ;;  %v1843_v27 = vpop.permute.xlu0 %1842 }
0x1550   :  { %v1847_v28 = vmul.f32 %v2625_v26, %v1843_v27 }
0x1551   :  { %1850 = vrot.lane.b32.xlu0 %v1846_v53, %s2732_s13 }
0x1552   :  { %1852 = vrot.lane.b32.xlu1 %v1847_v28, %s2732_s13 }
0x1587   :  { %v1755_v34 = vpop.permute.xlu1 %1754 }
0x1588   :  { %v1757_v9 = vmul.f32 %v2629_v33, %v1755_v34 }
0x158a   :  { %1759 = vrot.lane.b32.xlu0 %v1757_v9, %s2732_s13 }
0x15c3   :  { %v1851_v17 = vpop.permute.xlu0 %1850 }
0x15c4   :  { %v1856_v44 = vadd.f32 %v1851_v17, %v1836_v41  ;;  %v1853_v16 = vpop.permute.xlu1 %1852 }
0x15c5   :  { %v1857_v46 = vadd.f32 %v1853_v16, %v1837_v42 }
0x15c6   :  { %2630 = vtanh.f32 %v1856_v44 }
0x15c7   :  { %2632 = vtanh.f32 %v1857_v46 }
0x15d0   :  { %v2631_v47 = vpop.eup %2630 }
0x15d1   :  { %v2633_v49 = vpop.eup %2632  ;;  %1862 = vrot.lane.b32.xlu1 %v2631_v47, %s2732_s13 }
0x15d2   :  { %1864 = vrot.lane.b32.xlu0 %v2633_v49, %s2732_s13 }
0x15fc   :  { %v1760_v56 = vpop.permute.xlu0 %1759 }
0x15fd   :  { %v1762_v31 = vadd.f32 %v1760_v56, %v1752_v54 }
0x15ff   :  { %2634 = vtanh.f32 %v1762_v31 }
0x1609   :  { %v2635_v50 = vpop.eup %2634 }
0x160a   :  { %1765 = vrot.lane.b32.xlu1 %v2635_v50, %s2732_s13 }
0x1643   :  { %v1863_v18 = vpop.permute.xlu1 %1862 }
0x1644   :  { %v1868_v57 = vmul.f32 %v2623_v51, %v1863_v18  ;;  %v1865_v58 = vpop.permute.xlu0 %1864 }
0x1645   :  { %v1869_v60 = vmul.f32 %v2625_v26, %v1865_v58  ;;  %v2451_v26 = vld [vmem:[#allocation5 + $0x58] sm:$0xff]  }
0x1646   :  { %v1871_v45 = vpack.c.bf16 %v1868_v57, %v1868_v57 }
0x1647   :  { %v1872_v48 = vpack.c.bf16 %v1869_v60, %v1869_v60 }
0x1648   :  { %v1875_v20 = vunpack.c.l.b16 %v1871_v45 }
0x1649   :  { %v1876_v21 = vunpack.c.l.b16 %v1872_v48 }
0x164a   :  { %v1877_v36 = vrot.slane %v1875_v20, 7 }
0x164b   :  { %v1878_v62 = vrot.slane %v1876_v21, 6 }
0x164d   :  { %v1879_v37 = vsel %vm266_vm2, %v1878_v62, %v1877_v36 }
0x164e   :  { %v1880_v38 = vpack.c.b16 %v1879_v37, %v1879_v37 }
0x1650   :  { %1881 = vrot.lane.b32.xlu0 %v1880_v38, %s2727_s0 }
0x167c   :  { %v1766_v39 = vpop.permute.xlu1 %1765 }
0x167d   :  { %v1768_v52 = vmul.f32 %v2629_v33, %v1766_v39  ;;  %v2650_v33 = vld [vmem:[%s3218_s2] sm:$0x7] }
0x167e   :  { %v2001_v34 = vrot.slane %v2650_v33, %v2000_v30 }
0x167f   :  { %v1870_v1 = vpack.c.bf16 %v1768_v52, %v1768_v52 }
0x1681   :  { %1927 = vrot.lane.b32.xlu1 %v1870_v1, %s2727_s0 }
0x16c2   :  { %v1882_v3 = vpop.permute.xlu0 %1881 }
0x16c3   :  { %2410 = vmatmul.mubr.msk.bf16.vlgmr.msra.gmra.mrb[44].mxu0 %vm161_vm3, %v1882_v3 }
0x16c4   :  { %2425 = vmatprep.mubr.msk.bf16.mxu0 %vm2730_vm0, %v2729_v0 }
0x16f3   :  { %v1928_v4 = vpop.permute.xlu1 %1927 }
0x16f4   :  { %2418 = vmatmul.mubr.msk.bf16.vlgmr.msra.gmra.mrb[48].mxu1 %vm161_vm3, %v1928_v4 }
0x1796   :  { %v1920_v40 = vpop.f32.mrb[44].mxu0 }
0x1797   :  { %v2411_v2 = vpop.f32.mrb[45].mxu0 }
0x1798   :  { %v1923_v5 = vpop.f32.mrb[46].mxu0 }
0x1799   :  { %v2412_v6 = vpop.f32.mrb[47].mxu0 }
0x17c7   :  { %v1966_v11 = vpop.f32.mrb[48].mxu1 }
0x17c8   :  { %v1967_v7 = vadd.f32 %v1966_v11, %v1920_v40  ;;  %v2419_v8 = vpop.f32.mrb[49].mxu1 }
0x17c9   :  { %v1969_v10 = vpop.f32.mrb[50].mxu1 }
0x17ca   :  { %v1972_v43 = vadd.f32 %v1967_v7, %v2875_v35  ;;  %v2420_v14 = vpop.f32.mrb[51].mxu1  ;;  %v2450_v35 = vld [vmem:[#allocation5 + $0x50] sm:$0xff]  }
0x17cb   :  { %2422 = vmatpush3.bf16.msra.mxu0 %v2450_v35 }
0x17cc   :  { %2636 = vtanh.f32 %v1972_v43  ;;  %v2133_v24 = vmul.f32 -1.442695, %v1972_v43  ;;  %2423 = vmatprep.subr.bf16.mxu0 %v2729_v0 }
0x17ce   :  { %2638 = vpow2.f32 %v2133_v24 }
0x17cf   :  { %2424 = vmatpush3.bf16.msra.mxu0 %v2451_v26 }
0x17d6   :  { %v2637_v32 = vpop.eup %2636 }
0x17d7   :  { %1982 = vrot.lane.b32.xlu0 %v2637_v32, %s2732_s13 }
0x17d8   :  { %v2639_v25 = vpop.eup %2638 }
0x17d9   :  { %v1976_v61 = vadd.f32 1.0, %v2639_v25 }
0x17db   :  { %2640 = vrcp.f32 %v1976_v61 }
0x17e5   :  { %v2641_v19 = vpop.eup %2640 }
0x17e6   :  { %v1980_v22 = vmul.f32 %v2641_v19, %v1762_v31 }
0x1849   :  { %v1983_v59 = vpop.permute.xlu0 %1982 }
0x184a   :  { %v1985_v55 = vmul.f32 %v2641_v19, %v1983_v59 }
0x184c   :  { %1987 = vrot.lane.b32.xlu1 %v1985_v55, %s2732_s13 }
0x18be   :  { %v1988_v51 = vpop.permute.xlu1 %1987 }
0x18bf   :  { %v1990_v23 = vadd.f32 %v1988_v51, %v1980_v22 }
0x18c1   :  { %2642 = vtanh.f32 %v1990_v23 }
0x18cb   :  { %v2643_v53 = vpop.eup %2642 }
0x18cc   :  { %1993 = vrot.lane.b32.xlu0 %v2643_v53, %s2732_s13 }
0x193e   :  { %v1994_v27 = vpop.permute.xlu0 %1993 }
0x193f   :  { %v1996_v28 = vmul.f32 %v2641_v19, %v1994_v27 }
0x1941   :  { %v1997_v29 = vpack.c.bf16 %v1996_v28, %v1996_v28 }
0x1943   :  { %2003 = vrot.lane.b32.xlu1 %v1997_v29, %s2727_s0 }
0x19b5   :  { %v2004_v63 = vpop.permute.xlu1 %2003 }
0x19b6   :  { %2426 = vmatmul.mubr.msk.bf16.vlgmr.msra.gmra.mrb[48].mxu0 %vm161_vm3, %v2004_v63 }
0x1a89   :  { %v2054_v0 = vpop.f32.mrb[48].mxu0 }
0x1a8a   :  { %v2055_v9 = vadd.f32 %v2054_v0, %v2001_v34  ;;  %v2427_v13 = vpop.f32.mrb[49].mxu0 }
0x1a8b   :  { %v2057_v15 = vpop.f32.mrb[50].mxu0 }
0x1a8c   :  { %2060 = vst [vmem:[#allocation7] sm:$0x3] %v2055_v9  ;;  %v2428_v41 = vpop.f32.mrb[51].mxu0 }
0x1a8d   :  { %2706 = shalt.err (!%p2703_p6)
}
0x1a8e   :  { %s2707_s2 = scalar_lea.hbm %s3219_s3, 32 }
0x1a8f   :  { %p2708_p7 = scmp.ne.s32.totalorder %s3219_s3, %s2707_s2  ;;  %p2711_p8 = scmp.lt.u32.totalorder %s2707_s2, %s3219_s3 }
0x1a91   :  { %p2713_p9 = pnand %p2711_p8, %p2708_p7 }
0x1a93   :  { %2716 = shalt.err (!%p2713_p9)
}
0x1a94   :  { %2070 = dma.vmem_to_hbm [thread:$0]  %s2068_s17, 32, %s3219_s3, [#allocation4]  }
0x1a95   :  { %2721 = dma.done.wait [#allocation4], 32  }
0x1a96   :  { %2722 = vsyncadd [#allocation4], 4294967264 }
0x1a97   :  { %2074 = vsyncpa [#allocation3], 1 }
0x1a98   :  { %2075 = vsyncpa [#allocation6], 1 }
0x1a99   :  { %2076 = vsyncpa [#allocation4], 1 }

</bundles_post_ra>
